<compile_context>
chip_gen: v7x
topology: tpu7x:2x2x1
jax: 0.10.0
libtpu: 0.0.40
codegen_flags: <defaults>
</compile_context>

<pallas_src>
import math
import functools

import jax
import jax.numpy as jnp
from jax import lax
from jax.experimental import pallas as pl
from jax.experimental.pallas import tpu as pltpu


# ----------------------------- in-kernel helpers -----------------------------

def _layernorm(x, w, b, eps=1e-5):
    # PyTorch LayerNorm: biased variance over the last dim, eps inside the sqrt.
    mu = jnp.mean(x, axis=-1, keepdims=True)
    var = jnp.mean((x - mu) * (x - mu), axis=-1, keepdims=True)
    return (x - mu) * lax.rsqrt(var + eps) * w + b


def _gelu_tanh(x):
    # tanh-approximate GELU (tanh runs on the EUP, leaving the VALU slot free).
    # Reference nn.GELU() is exact-erf; max abs deviation ~1e-3 (inference-OK).
    c = math.sqrt(2.0 / math.pi)
    return 0.5 * x * (1.0 + jnp.tanh(c * (x + 0.044715 * x * x * x)))


# ------------------------------- Pallas kernels -------------------------------

def decoder_block_kernel(x_ref, ln1w_ref, ln1b_ref, wqkv_ref, bqkv_ref,
                         wo_ref, bo_ref, ln2w_ref, ln2b_ref,
                         w1_ref, b1_ref, w2_ref, b2_ref,
                         o_ref, qkv_scr, ctx_scr, *, n_heads):
    x = x_ref[0].astype(jnp.float32)                       # (T, D) f32
    T, D = x.shape
    H = n_heads
    hd = D // H

    # --- norm1 (f32) ---
    xn = _layernorm(x, ln1w_ref[...], ln1b_ref[...])       # (T, D)

    # --- fused QKV projection: one wide bf16 matmul, f32 accumulate ---
    # 1/sqrt(hd) is pre-folded into the q columns of wqkv / bqkv at init time.
    qkv = jnp.dot(xn.astype(jnp.bfloat16), wqkv_ref[...],
                  preferred_element_type=jnp.float32) + bqkv_ref[...]   # (T, 3D)

    # Physical head split (T,3D) -> (3H,T,hd) via VMEM scratch: lane slices +
    # stores only (this is the data movement a reshape+transpose implies).
    for i in range(3 * H):
        qkv_scr[i] = qkv[:, i * hd:(i + 1) * hd].astype(jnp.bfloat16)
    q = qkv_scr[0:H]                                       # (H, T, hd) bf16
    k = qkv_scr[H:2 * H]
    v = qkv_scr[2 * H:3 * H]

    # --- head-batched causal attention (scores / softmax in f32) ---
    s = jnp.einsum("hqd,hkd->hqk", q, k,
                   preferred_element_type=jnp.float32)     # (H, T, T) f32
    row = lax.broadcasted_iota(jnp.int32, (T, T), 0)
    col = lax.broadcasted_iota(jnp.int32, (T, T), 1)
    # causal mask applied directly on the f32 scores (no separate mask temp).
    s = jnp.where((col <= row)[None, :, :], s, -1e30)
    s = s - jnp.max(s, axis=-1, keepdims=True)
    p = jnp.exp(s)
    p = p * pl.reciprocal(jnp.sum(p, axis=-1, keepdims=True), approx=True)

    ctx = jnp.einsum("hqk,hkd->hqd", p.astype(jnp.bfloat16), v,
                     preferred_element_type=jnp.float32)   # (H, T, hd) f32

    # Head merge (H,T,hd) -> (T,D) via VMEM scratch, then ONE dense (T,D)@(D,D)
    # output projection (full-K MXU fill; no per-head matmuls / leading-axis sum).
    for h in range(H):
        ctx_scr[:, h * hd:(h + 1) * hd] = ctx[h].astype(jnp.bfloat16)
    attn = jnp.dot(ctx_scr[...], wo_ref[...],
                   preferred_element_type=jnp.float32) + bo_ref[...]    # (T, D)

    # NOTE: the reference module overwrites x with norm1(x) before the residual
    # add, so the residual is taken on the *normalized* activations.
    x1 = xn + attn                                         # dropout -> identity

    # --- norm2 + MLP (f32 norm / GELU, bf16 matmul inputs, f32 accumulate) ---
    x2n = _layernorm(x1, ln2w_ref[...], ln2b_ref[...])
    h1 = jnp.dot(x2n.astype(jnp.bfloat16), w1_ref[...],
                 preferred_element_type=jnp.float32) + b1_ref[...]
    h1 = _gelu_tanh(h1)
    h2 = jnp.dot(h1.astype(jnp.bfloat16), w2_ref[...],
                 preferred_element_type=jnp.float32) + b2_ref[...]

    o_ref[0] = (x1 + h2).astype(o_ref.dtype)               # bf16 residual stream


def head_kernel(x_ref, lnw_ref, lnb_ref, wh_ref, bh_ref, o_ref):
    # x_ref: (rows, D) tile of the flattened (B*T, D) bf16 residual stream.
    xn = _layernorm(x_ref[...].astype(jnp.float32), lnw_ref[...], lnb_ref[...])
    o_ref[...] = jnp.dot(xn.astype(jnp.bfloat16), wh_ref[...],
                         preferred_element_type=jnp.float32) + bh_ref[...]


# --------------------------------- wrappers -----------------------------------

def _derive_vmem_limit():
    # Per-generation VMEM budget (do NOT hard-code 64 MiB: that is the entire
    # per-TensorCore VMEM on v7x).  ~80% of capacity, capped at 100 MiB:
    # v5e/v6e (128 MiB) -> 100 MiB;  v7x (64 MiB) -> ~51 MiB.
    cap = 128 * 1024 * 1024
    try:
        cap = int(pltpu.get_tpu_info().vmem_capacity_bytes)
    except Exception:
        pass
    return min(int(cap * 0.8), 100 * 1024 * 1024)


_VMEM_LIMIT = _derive_vmem_limit()


def _rep_spec(a):
    # Grid-invariant (replicated) weight block.
    nd = a.ndim
    return pl.BlockSpec(a.shape, lambda *_, _nd=nd: (0,) * _nd)


def run_decoder_block(x, p, n_heads):
    B, T, D = x.shape
    hd = D // n_heads
    weights = (p["ln1_w"], p["ln1_b"], p["wqkv"], p["bqkv"], p["wo"], p["bo"],
               p["ln2_w"], p["ln2_b"], p["w_1"], p["b_1"], p["w_2"], p["b_2"])
    return pl.pallas_call(
        functools.partial(decoder_block_kernel, n_heads=n_heads),
        out_shape=jax.ShapeDtypeStruct((B, T, D), jnp.bfloat16),
        grid=(B,),
        in_specs=[pl.BlockSpec((1, T, D), lambda b: (b, 0, 0))]
                 + [_rep_spec(w) for w in weights],
        out_specs=pl.BlockSpec((1, T, D), lambda b: (b, 0, 0)),
        scratch_shapes=[pltpu.VMEM((3 * n_heads, T, hd), jnp.bfloat16),  # qkv heads
                        pltpu.VMEM((T, D), jnp.bfloat16)],               # merged ctx
        compiler_params=pltpu.CompilerParams(
            dimension_semantics=("parallel",),
            vmem_limit_bytes=_VMEM_LIMIT),
    )(x, *weights)


def run_head(x, lnw, lnb, wh, bh, vocab):
    # Fold batch*seq into rows (tile up to 512); tile the (128-padded) vocab
    # axis with its own grid axis so w_head is never held whole in VMEM.
    B, T, D = x.shape
    BT = B * T
    Vp = wh.shape[1]
    xf = x.reshape(BT, D)

    rows = BT if BT <= 512 else 512
    assert BT % rows == 0, "row tile must divide B*T"
    tile_v = min(Vp, 2048)
    if Vp % tile_v:
        tile_v = math.gcd(Vp, tile_v)          # >= 128 since Vp % 128 == 0

    out = pl.pallas_call(
        head_kernel,
        out_shape=jax.ShapeDtypeStruct((BT, Vp), jnp.float32),
        grid=(BT // rows, Vp // tile_v),
        in_specs=[pl.BlockSpec((rows, D), lambda r, v: (r, 0)),
                  pl.BlockSpec(lnw.shape, lambda r, v: (0, 0)),
                  pl.BlockSpec(lnb.shape, lambda r, v: (0, 0)),
                  pl.BlockSpec((D, tile_v), lambda r, v: (0, v)),
                  pl.BlockSpec((1, tile_v), lambda r, v: (0, v))],
        out_specs=pl.BlockSpec((rows, tile_v), lambda r, v: (r, v)),
        compiler_params=pltpu.CompilerParams(
            dimension_semantics=("parallel", "parallel"),
            vmem_limit_bytes=_VMEM_LIMIT),
    )(xf, lnw, lnb, wh, bh)
    # TODO(synk): at realistic vocab sizes, consume the 128-padded logits
    # downstream (mask the pad) instead of paying this slice's HBM round trip.
    if Vp != vocab:
        out = out[:, :vocab]
    return out.reshape(B, T, vocab)


# --------------------------- glue (plain JAX, no hot path) ---------------------

def sinusoidal_encoding(T, D):
    pos = jnp.arange(T, dtype=jnp.float32)[:, None]
    i = jnp.arange(D, dtype=jnp.float32)[None, :]
    angle_rates = 1.0 / jnp.power(10000.0, 2.0 * jnp.floor(i / 2.0) / D)
    ang = pos * angle_rates
    even = (jnp.arange(D) % 2) == 0
    return jnp.where(even[None, :], jnp.sin(ang), jnp.cos(ang))[None]   # (1, T, D)


def init_params(key, vocab, d_model, d_ff, n_layers, n_heads):
    hd = d_model // n_heads
    scale = 1.0 / math.sqrt(hd)
    keys = jax.random.split(key, 2 + n_layers)
    params = {
        "token_embed": 0.02 * jax.random.normal(keys[0], (vocab, d_model), jnp.float32),
        "blocks": [],
    }
    for l in range(n_layers):
        k = jax.random.split(keys[1 + l], 6)
        wq = 0.02 * jax.random.normal(k[0], (d_model, d_model), jnp.float32)
        wk = 0.02 * jax.random.normal(k[1], (d_model, d_model), jnp.float32)
        wv = 0.02 * jax.random.normal(k[2], (d_model, d_model), jnp.float32)
        wo = 0.02 * jax.random.normal(k[3], (d_model, d_model), jnp.float32)
        # Fused QKV weight; the 1/sqrt(hd) attention scale is folded into wq.
        wqkv = jnp.concatenate([wq * scale, wk, wv], axis=1)            # (D, 3D)
        params["blocks"].append({
            "ln1_w": jnp.ones((1, d_model), jnp.float32),
            "ln1_b": jnp.zeros((1, d_model), jnp.float32),
            "wqkv": wqkv.astype(jnp.bfloat16),
            "bqkv": jnp.zeros((1, 3 * d_model), jnp.float32),
            "wo": wo.astype(jnp.bfloat16),
            "bo": jnp.zeros((1, d_model), jnp.float32),
            "ln2_w": jnp.ones((1, d_model), jnp.float32),
            "ln2_b": jnp.zeros((1, d_model), jnp.float32),
            "w_1": (0.02 * jax.random.normal(k[4], (d_model, d_ff), jnp.float32)
                    ).astype(jnp.bfloat16),
            "b_1": jnp.zeros((1, d_ff), jnp.float32),
            "w_2": (0.02 * jax.random.normal(k[5], (d_ff, d_model), jnp.float32)
                    ).astype(jnp.bfloat16),
            "b_2": jnp.zeros((1, d_model), jnp.float32),
        })
    kf = keys[1 + n_layers]
    vocab_pad = ((vocab + 127) // 128) * 128            # lane-dense lm-head output
    w_head = 0.02 * jax.random.normal(kf, (d_model, vocab), jnp.float32)
    params["ln_f_w"] = jnp.ones((1, d_model), jnp.float32)
    params["ln_f_b"] = jnp.zeros((1, d_model), jnp.float32)
    params["w_head"] = (jnp.zeros((d_model, vocab_pad), jnp.float32)
                        .at[:, :vocab].set(w_head)).astype(jnp.bfloat16)
    params["b_head"] = jnp.zeros((1, vocab_pad), jnp.float32)
    return params


def gpt_forward(token_ids, params, *, n_heads):
    B, T = token_ids.shape
    V, D = params["token_embed"].shape
    tok = params["token_embed"][token_ids]                 # embedding gather (glue)
    # dropout -> identity; residual stream kept in bf16 between layer kernels.
    x = (tok + sinusoidal_encoding(T, D)).astype(jnp.bfloat16)
    for bp in params["blocks"]:
        x = run_decoder_block(x, bp, n_heads)
    return run_head(x, params["ln_f_w"], params["ln_f_b"],
                    params["w_head"], params["b_head"], V)


# ----------------------------------- main --------------------------------------

if __name__ == "__main__":
    vocab_size, d_model, d_ff, n_layers, n_heads, dropout = 64, 32, 64, 2, 4, 0.0
    B, T = 2, 8

    key = jax.random.PRNGKey(0)
    k_tok, k_par = jax.random.split(key)
    token_ids = jax.random.randint(k_tok, (B, T), 0, vocab_size, dtype=jnp.int32)
    params = init_params(k_par, vocab_size, d_model, d_ff, n_layers, n_heads)

    fwd = jax.jit(functools.partial(gpt_forward, n_heads=n_heads))
    logits = fwd(token_ids, params)
    jax.block_until_ready(logits)
    assert logits.shape == (B, T, vocab_size) and logits.dtype == jnp.float32
    assert bool(jnp.all(jnp.isfinite(logits)))
    print("KERNEL_OK")
</pallas_src>

<mosaic_0001>
module attributes {stable_mosaic.version = 11 : i64} {
  func.func @decoder_block_kernel(%arg0: i32, %arg1: memref<1x8x32xbf16, #tpu.memory_space<vmem>>, %arg2: memref<1x32xf32, #tpu.memory_space<vmem>>, %arg3: memref<1x32xf32, #tpu.memory_space<vmem>>, %arg4: memref<32x96xbf16, #tpu.memory_space<vmem>>, %arg5: memref<1x96xf32, #tpu.memory_space<vmem>>, %arg6: memref<32x32xbf16, #tpu.memory_space<vmem>>, %arg7: memref<1x32xf32, #tpu.memory_space<vmem>>, %arg8: memref<1x32xf32, #tpu.memory_space<vmem>>, %arg9: memref<1x32xf32, #tpu.memory_space<vmem>>, %arg10: memref<32x64xbf16, #tpu.memory_space<vmem>>, %arg11: memref<1x64xf32, #tpu.memory_space<vmem>>, %arg12: memref<64x32xbf16, #tpu.memory_space<vmem>>, %arg13: memref<1x32xf32, #tpu.memory_space<vmem>>, %arg14: memref<1x8x32xbf16, #tpu.memory_space<vmem>>, %arg15: memref<12x8x8xbf16, #tpu.memory_space<vmem>>, %arg16: memref<8x32xbf16, #tpu.memory_space<vmem>>) attributes {dimension_semantics = [#tpu.dimension_semantics<parallel>], iteration_bounds = array<i64: 2>, scalar_prefetch = 0 : i64, scratch_operands = 2 : i64, tpu.core_type = #tpu.core_type<tc>, window_params = [{transform_indices = @transform_0, window_bounds = array<i64: 1, 8, 32>}, {pipeline_mode = #tpu.pipeline_mode<synchronous>, transform_indices = @transform_1, window_bounds = array<i64: 1, 32>}, {pipeline_mode = #tpu.pipeline_mode<synchronous>, transform_indices = @transform_2, window_bounds = array<i64: 1, 32>}, {pipeline_mode = #tpu.pipeline_mode<synchronous>, transform_indices = @transform_3, window_bounds = array<i64: 32, 96>}, {pipeline_mode = #tpu.pipeline_mode<synchronous>, transform_indices = @transform_4, window_bounds = array<i64: 1, 96>}, {pipeline_mode = #tpu.pipeline_mode<synchronous>, transform_indices = @transform_5, window_bounds = array<i64: 32, 32>}, {pipeline_mode = #tpu.pipeline_mode<synchronous>, transform_indices = @transform_6, window_bounds = array<i64: 1, 32>}, {pipeline_mode = #tpu.pipeline_mode<synchronous>, transform_indices = @transform_7, window_bounds = array<i64: 1, 32>}, {pipeline_mode = #tpu.pipeline_mode<synchronous>, transform_indices = @transform_8, window_bounds = array<i64: 1, 32>}, {pipeline_mode = #tpu.pipeline_mode<synchronous>, transform_indices = @transform_9, window_bounds = array<i64: 32, 64>}, {pipeline_mode = #tpu.pipeline_mode<synchronous>, transform_indices = @transform_10, window_bounds = array<i64: 1, 64>}, {pipeline_mode = #tpu.pipeline_mode<synchronous>, transform_indices = @transform_11, window_bounds = array<i64: 64, 32>}, {pipeline_mode = #tpu.pipeline_mode<synchronous>, transform_indices = @transform_12, window_bounds = array<i64: 1, 32>}, {transform_indices = @transform_13, window_bounds = array<i64: 1, 8, 32>}]} {
    %c0 = arith.constant 0 : index
    %c0_0 = arith.constant 0 : index
    %c0_1 = arith.constant 0 : index
    %0 = vector.load %arg1[%c0, %c0_0, %c0_1] : memref<1x8x32xbf16, #tpu.memory_space<vmem>>, vector<1x8x32xbf16>
    %1 = vector.shape_cast %0 : vector<1x8x32xbf16> to vector<8x32xbf16>
    %2 = arith.extf %1 : vector<8x32xbf16> to vector<8x32xf32>
    %c0_2 = arith.constant 0 : index
    %c0_3 = arith.constant 0 : index
    %3 = vector.load %arg2[%c0_2, %c0_3] : memref<1x32xf32, #tpu.memory_space<vmem>>, vector<1x32xf32>
    %c0_4 = arith.constant 0 : index
    %c0_5 = arith.constant 0 : index
    %4 = vector.load %arg3[%c0_4, %c0_5] : memref<1x32xf32, #tpu.memory_space<vmem>>, vector<1x32xf32>
    %cst = arith.constant dense<0.000000e+00> : vector<8xf32>
    %5 = vector.multi_reduction <add>, %2, %cst [1] : vector<8x32xf32> to vector<8xf32>
    %6 = vector.shape_cast %5 : vector<8xf32> to vector<8x1xf32>
    %cst_6 = arith.constant 3.200000e+01 : f32
    %7 = vector.broadcast %cst_6 : f32 to vector<8x1xf32>
    %8 = arith.divf %6, %7 : vector<8x1xf32>
    %9 = vector.broadcast %8 : vector<8x1xf32> to vector<8x32xf32>
    %10 = arith.subf %2, %9 : vector<8x32xf32>
    %11 = vector.broadcast %8 : vector<8x1xf32> to vector<8x32xf32>
    %12 = arith.subf %2, %11 : vector<8x32xf32>
    %13 = arith.mulf %10, %12 : vector<8x32xf32>
    %cst_7 = arith.constant dense<0.000000e+00> : vector<8xf32>
    %14 = vector.multi_reduction <add>, %13, %cst_7 [1] : vector<8x32xf32> to vector<8xf32>
    %15 = vector.shape_cast %14 : vector<8xf32> to vector<8x1xf32>
    %cst_8 = arith.constant 3.200000e+01 : f32
    %16 = vector.broadcast %cst_8 : f32 to vector<8x1xf32>
    %17 = arith.divf %15, %16 : vector<8x1xf32>
    %18 = vector.broadcast %8 : vector<8x1xf32> to vector<8x32xf32>
    %19 = arith.subf %2, %18 : vector<8x32xf32>
    %cst_9 = arith.constant 9.99999974E-6 : f32
    %20 = vector.broadcast %cst_9 : f32 to vector<8x1xf32>
    %21 = arith.addf %17, %20 : vector<8x1xf32>
    %22 = math.rsqrt %21 : vector<8x1xf32>
    %23 = vector.broadcast %22 : vector<8x1xf32> to vector<8x32xf32>
    %24 = arith.mulf %19, %23 : vector<8x32xf32>
    %25 = vector.broadcast %3 : vector<1x32xf32> to vector<8x32xf32>
    %26 = arith.mulf %24, %25 : vector<8x32xf32>
    %27 = vector.broadcast %4 : vector<1x32xf32> to vector<8x32xf32>
    %28 = arith.addf %26, %27 : vector<8x32xf32>
    %29 = arith.truncf %28 : vector<8x32xf32> to vector<8x32xbf16>
    %c0_10 = arith.constant 0 : index
    %c0_11 = arith.constant 0 : index
    %30 = vector.load %arg4[%c0_10, %c0_11] : memref<32x96xbf16, #tpu.memory_space<vmem>>, vector<32x96xbf16>
    %cst_12 = arith.constant dense<0.000000e+00> : vector<8x96xf32>
    %31 = tpu.matmul %29, %30, %cst_12 {dimension_numbers = #tpu.dot_dimension_numbers<[1], [0], [0], [1], [0, 0, 1, 1], [], []>} : vector<8x32xbf16>, vector<32x96xbf16>, vector<8x96xf32> -> vector<8x96xf32>
    %c0_13 = arith.constant 0 : index
    %c0_14 = arith.constant 0 : index
    %32 = vector.load %arg5[%c0_13, %c0_14] : memref<1x96xf32, #tpu.memory_space<vmem>>, vector<1x96xf32>
    %33 = vector.broadcast %32 : vector<1x96xf32> to vector<8x96xf32>
    %34 = arith.addf %31, %33 : vector<8x96xf32>
    %35 = vector.extract_strided_slice %34 {offsets = [0, 0], sizes = [8, 8], strides = [1, 1]} : vector<8x96xf32> to vector<8x8xf32>
    %36 = arith.truncf %35 : vector<8x8xf32> to vector<8x8xbf16>
    %c0_15 = arith.constant 0 : index
    %c0_16 = arith.constant 0 : index
    %c0_17 = arith.constant 0 : index
    %37 = vector.load %arg15[%c0_15, %c0_16, %c0_17] : memref<12x8x8xbf16, #tpu.memory_space<vmem>>, vector<1x8x8xbf16>
    %38 = vector.shape_cast %37 : vector<1x8x8xbf16> to vector<8x8xbf16>
    %39 = vector.shape_cast %36 : vector<8x8xbf16> to vector<1x8x8xbf16>
    tpu.vector_store %arg15[%c0_15, %c0_16, %c0_17], %39 {strides = array<i32>} : memref<12x8x8xbf16, #tpu.memory_space<vmem>>, vector<1x8x8xbf16>,
    %40 = vector.extract_strided_slice %34 {offsets = [0, 8], sizes = [8, 8], strides = [1, 1]} : vector<8x96xf32> to vector<8x8xf32>
    %41 = arith.truncf %40 : vector<8x8xf32> to vector<8x8xbf16>
    %c1 = arith.constant 1 : index
    %c0_18 = arith.constant 0 : index
    %c0_19 = arith.constant 0 : index
    %42 = vector.load %arg15[%c1, %c0_18, %c0_19] : memref<12x8x8xbf16, #tpu.memory_space<vmem>>, vector<1x8x8xbf16>
    %43 = vector.shape_cast %42 : vector<1x8x8xbf16> to vector<8x8xbf16>
    %44 = vector.shape_cast %41 : vector<8x8xbf16> to vector<1x8x8xbf16>
    tpu.vector_store %arg15[%c1, %c0_18, %c0_19], %44 {strides = array<i32>} : memref<12x8x8xbf16, #tpu.memory_space<vmem>>, vector<1x8x8xbf16>,
    %45 = vector.extract_strided_slice %34 {offsets = [0, 16], sizes = [8, 8], strides = [1, 1]} : vector<8x96xf32> to vector<8x8xf32>
    %46 = arith.truncf %45 : vector<8x8xf32> to vector<8x8xbf16>
    %c2 = arith.constant 2 : index
    %c0_20 = arith.constant 0 : index
    %c0_21 = arith.constant 0 : index
    %47 = vector.load %arg15[%c2, %c0_20, %c0_21] : memref<12x8x8xbf16, #tpu.memory_space<vmem>>, vector<1x8x8xbf16>
    %48 = vector.shape_cast %47 : vector<1x8x8xbf16> to vector<8x8xbf16>
    %49 = vector.shape_cast %46 : vector<8x8xbf16> to vector<1x8x8xbf16>
    tpu.vector_store %arg15[%c2, %c0_20, %c0_21], %49 {strides = array<i32>} : memref<12x8x8xbf16, #tpu.memory_space<vmem>>, vector<1x8x8xbf16>,
    %50 = vector.extract_strided_slice %34 {offsets = [0, 24], sizes = [8, 8], strides = [1, 1]} : vector<8x96xf32> to vector<8x8xf32>
    %51 = arith.truncf %50 : vector<8x8xf32> to vector<8x8xbf16>
    %c3 = arith.constant 3 : index
    %c0_22 = arith.constant 0 : index
    %c0_23 = arith.constant 0 : index
    %52 = vector.load %arg15[%c3, %c0_22, %c0_23] : memref<12x8x8xbf16, #tpu.memory_space<vmem>>, vector<1x8x8xbf16>
    %53 = vector.shape_cast %52 : vector<1x8x8xbf16> to vector<8x8xbf16>
    %54 = vector.shape_cast %51 : vector<8x8xbf16> to vector<1x8x8xbf16>
    tpu.vector_store %arg15[%c3, %c0_22, %c0_23], %54 {strides = array<i32>} : memref<12x8x8xbf16, #tpu.memory_space<vmem>>, vector<1x8x8xbf16>,
    %55 = vector.extract_strided_slice %34 {offsets = [0, 32], sizes = [8, 8], strides = [1, 1]} : vector<8x96xf32> to vector<8x8xf32>
    %56 = arith.truncf %55 : vector<8x8xf32> to vector<8x8xbf16>
    %c4 = arith.constant 4 : index
    %c0_24 = arith.constant 0 : index
    %c0_25 = arith.constant 0 : index
    %57 = vector.load %arg15[%c4, %c0_24, %c0_25] : memref<12x8x8xbf16, #tpu.memory_space<vmem>>, vector<1x8x8xbf16>
    %58 = vector.shape_cast %57 : vector<1x8x8xbf16> to vector<8x8xbf16>
    %59 = vector.shape_cast %56 : vector<8x8xbf16> to vector<1x8x8xbf16>
    tpu.vector_store %arg15[%c4, %c0_24, %c0_25], %59 {strides = array<i32>} : memref<12x8x8xbf16, #tpu.memory_space<vmem>>, vector<1x8x8xbf16>,
    %60 = vector.extract_strided_slice %34 {offsets = [0, 40], sizes = [8, 8], strides = [1, 1]} : vector<8x96xf32> to vector<8x8xf32>
    %61 = arith.truncf %60 : vector<8x8xf32> to vector<8x8xbf16>
    %c5 = arith.constant 5 : index
    %c0_26 = arith.constant 0 : index
    %c0_27 = arith.constant 0 : index
    %62 = vector.load %arg15[%c5, %c0_26, %c0_27] : memref<12x8x8xbf16, #tpu.memory_space<vmem>>, vector<1x8x8xbf16>
    %63 = vector.shape_cast %62 : vector<1x8x8xbf16> to vector<8x8xbf16>
    %64 = vector.shape_cast %61 : vector<8x8xbf16> to vector<1x8x8xbf16>
    tpu.vector_store %arg15[%c5, %c0_26, %c0_27], %64 {strides = array<i32>} : memref<12x8x8xbf16, #tpu.memory_space<vmem>>, vector<1x8x8xbf16>,
    %65 = vector.extract_strided_slice %34 {offsets = [0, 48], sizes = [8, 8], strides = [1, 1]} : vector<8x96xf32> to vector<8x8xf32>
    %66 = arith.truncf %65 : vector<8x8xf32> to vector<8x8xbf16>
    %c6 = arith.constant 6 : index
    %c0_28 = arith.constant 0 : index
    %c0_29 = arith.constant 0 : index
    %67 = vector.load %arg15[%c6, %c0_28, %c0_29] : memref<12x8x8xbf16, #tpu.memory_space<vmem>>, vector<1x8x8xbf16>
    %68 = vector.shape_cast %67 : vector<1x8x8xbf16> to vector<8x8xbf16>
    %69 = vector.shape_cast %66 : vector<8x8xbf16> to vector<1x8x8xbf16>
    tpu.vector_store %arg15[%c6, %c0_28, %c0_29], %69 {strides = array<i32>} : memref<12x8x8xbf16, #tpu.memory_space<vmem>>, vector<1x8x8xbf16>,
    %70 = vector.extract_strided_slice %34 {offsets = [0, 56], sizes = [8, 8], strides = [1, 1]} : vector<8x96xf32> to vector<8x8xf32>
    %71 = arith.truncf %70 : vector<8x8xf32> to vector<8x8xbf16>
    %c7 = arith.constant 7 : index
    %c0_30 = arith.constant 0 : index
    %c0_31 = arith.constant 0 : index
    %72 = vector.load %arg15[%c7, %c0_30, %c0_31] : memref<12x8x8xbf16, #tpu.memory_space<vmem>>, vector<1x8x8xbf16>
    %73 = vector.shape_cast %72 : vector<1x8x8xbf16> to vector<8x8xbf16>
    %74 = vector.shape_cast %71 : vector<8x8xbf16> to vector<1x8x8xbf16>
    tpu.vector_store %arg15[%c7, %c0_30, %c0_31], %74 {strides = array<i32>} : memref<12x8x8xbf16, #tpu.memory_space<vmem>>, vector<1x8x8xbf16>,
    %75 = vector.extract_strided_slice %34 {offsets = [0, 64], sizes = [8, 8], strides = [1, 1]} : vector<8x96xf32> to vector<8x8xf32>
    %76 = arith.truncf %75 : vector<8x8xf32> to vector<8x8xbf16>
    %c8 = arith.constant 8 : index
    %c0_32 = arith.constant 0 : index
    %c0_33 = arith.constant 0 : index
    %77 = vector.load %arg15[%c8, %c0_32, %c0_33] : memref<12x8x8xbf16, #tpu.memory_space<vmem>>, vector<1x8x8xbf16>
    %78 = vector.shape_cast %77 : vector<1x8x8xbf16> to vector<8x8xbf16>
    %79 = vector.shape_cast %76 : vector<8x8xbf16> to vector<1x8x8xbf16>
    tpu.vector_store %arg15[%c8, %c0_32, %c0_33], %79 {strides = array<i32>} : memref<12x8x8xbf16, #tpu.memory_space<vmem>>, vector<1x8x8xbf16>,
    %80 = vector.extract_strided_slice %34 {offsets = [0, 72], sizes = [8, 8], strides = [1, 1]} : vector<8x96xf32> to vector<8x8xf32>
    %81 = arith.truncf %80 : vector<8x8xf32> to vector<8x8xbf16>
    %c9 = arith.constant 9 : index
    %c0_34 = arith.constant 0 : index
    %c0_35 = arith.constant 0 : index
    %82 = vector.load %arg15[%c9, %c0_34, %c0_35] : memref<12x8x8xbf16, #tpu.memory_space<vmem>>, vector<1x8x8xbf16>
    %83 = vector.shape_cast %82 : vector<1x8x8xbf16> to vector<8x8xbf16>
    %84 = vector.shape_cast %81 : vector<8x8xbf16> to vector<1x8x8xbf16>
    tpu.vector_store %arg15[%c9, %c0_34, %c0_35], %84 {strides = array<i32>} : memref<12x8x8xbf16, #tpu.memory_space<vmem>>, vector<1x8x8xbf16>,
    %85 = vector.extract_strided_slice %34 {offsets = [0, 80], sizes = [8, 8], strides = [1, 1]} : vector<8x96xf32> to vector<8x8xf32>
    %86 = arith.truncf %85 : vector<8x8xf32> to vector<8x8xbf16>
    %c10 = arith.constant 10 : index
    %c0_36 = arith.constant 0 : index
    %c0_37 = arith.constant 0 : index
    %87 = vector.load %arg15[%c10, %c0_36, %c0_37] : memref<12x8x8xbf16, #tpu.memory_space<vmem>>, vector<1x8x8xbf16>
    %88 = vector.shape_cast %87 : vector<1x8x8xbf16> to vector<8x8xbf16>
    %89 = vector.shape_cast %86 : vector<8x8xbf16> to vector<1x8x8xbf16>
    tpu.vector_store %arg15[%c10, %c0_36, %c0_37], %89 {strides = array<i32>} : memref<12x8x8xbf16, #tpu.memory_space<vmem>>, vector<1x8x8xbf16>,
    %90 = vector.extract_strided_slice %34 {offsets = [0, 88], sizes = [8, 8], strides = [1, 1]} : vector<8x96xf32> to vector<8x8xf32>
    %91 = arith.truncf %90 : vector<8x8xf32> to vector<8x8xbf16>
    %c11 = arith.constant 11 : index
    %c0_38 = arith.constant 0 : index
    %c0_39 = arith.constant 0 : index
    %92 = vector.load %arg15[%c11, %c0_38, %c0_39] : memref<12x8x8xbf16, #tpu.memory_space<vmem>>, vector<1x8x8xbf16>
    %93 = vector.shape_cast %92 : vector<1x8x8xbf16> to vector<8x8xbf16>
    %94 = vector.shape_cast %91 : vector<8x8xbf16> to vector<1x8x8xbf16>
    tpu.vector_store %arg15[%c11, %c0_38, %c0_39], %94 {strides = array<i32>} : memref<12x8x8xbf16, #tpu.memory_space<vmem>>, vector<1x8x8xbf16>,
    %c0_40 = arith.constant 0 : index
    %c0_41 = arith.constant 0 : index
    %c0_42 = arith.constant 0 : index
    %95 = vector.load %arg15[%c0_40, %c0_41, %c0_42] : memref<12x8x8xbf16, #tpu.memory_space<vmem>>, vector<4x8x8xbf16>
    %c4_43 = arith.constant 4 : index
    %c0_44 = arith.constant 0 : index
    %c0_45 = arith.constant 0 : index
    %96 = vector.load %arg15[%c4_43, %c0_44, %c0_45] : memref<12x8x8xbf16, #tpu.memory_space<vmem>>, vector<4x8x8xbf16>
    %c8_46 = arith.constant 8 : index
    %c0_47 = arith.constant 0 : index
    %c0_48 = arith.constant 0 : index
    %97 = vector.load %arg15[%c8_46, %c0_47, %c0_48] : memref<12x8x8xbf16, #tpu.memory_space<vmem>>, vector<4x8x8xbf16>
    "tpu.trace_start"() <{level = 10 : i32, message = "hqd,hkd->hqk"}> : () -> ()
    %cst_49 = arith.constant dense<0.000000e+00> : vector<4x8x8xf32>
    %98 = tpu.matmul %95, %96, %cst_49 {dimension_numbers = #tpu.dot_dimension_numbers<[2], [2], [1], [1], [0, 0, 0, 1, 1, 1], [0], [0]>} : vector<4x8x8xbf16>, vector<4x8x8xbf16>, vector<4x8x8xf32> -> vector<4x8x8xf32>
    "tpu.trace_stop"() : () -> ()
    %99 = tpu.iota {dimensions = array<i32: 0>} : vector<8x8xi32>
    %100 = tpu.iota {dimensions = array<i32: 1>} : vector<8x8xi32>
    %101 = arith.cmpi sle, %100, %99 : vector<8x8xi32>
    %102 = vector.shape_cast %101 : vector<8x8xi1> to vector<1x8x8xi1>
    %cst_50 = arith.constant -1.000000e+30 : f32
    %103 = vector.shape_cast %102 : vector<1x8x8xi1> to vector<1x8x8xi1>
    %104 = vector.broadcast %103 : vector<1x8x8xi1> to vector<4x8x8xi1>
    %105 = vector.broadcast %cst_50 : f32 to vector<4x8x8xf32>
    %106 = arith.select %104, %98, %105 : vector<4x8x8xi1>, vector<4x8x8xf32>
    %cst_51 = arith.constant dense<0xFF800000> : vector<4x8xf32>
    %107 = vector.multi_reduction <maximumf>, %106, %cst_51 [2] : vector<4x8x8xf32> to vector<4x8xf32>
    %108 = vector.shape_cast %107 : vector<4x8xf32> to vector<4x8x1xf32>
    %109 = vector.broadcast %108 : vector<4x8x1xf32> to vector<4x8x8xf32>
    %110 = arith.subf %106, %109 : vector<4x8x8xf32>
    %111 = math.exp %110 : vector<4x8x8xf32>
    %cst_52 = arith.constant dense<0.000000e+00> : vector<4x8xf32>
    %112 = vector.multi_reduction <add>, %111, %cst_52 [2] : vector<4x8x8xf32> to vector<4x8xf32>
    %113 = vector.shape_cast %112 : vector<4x8xf32> to vector<4x8x1xf32>
    %114 = tpu.reciprocal %113 {approx = true} : vector<4x8x1xf32> -> vector<4x8x1xf32>
    %115 = vector.broadcast %114 : vector<4x8x1xf32> to vector<4x8x8xf32>
    %116 = arith.mulf %111, %115 : vector<4x8x8xf32>
    %117 = arith.truncf %116 : vector<4x8x8xf32> to vector<4x8x8xbf16>
    "tpu.trace_start"() <{level = 10 : i32, message = "hqk,hkd->hqd"}> : () -> ()
    %cst_53 = arith.constant dense<0.000000e+00> : vector<4x8x8xf32>
    %118 = tpu.matmul %117, %97, %cst_53 {dimension_numbers = #tpu.dot_dimension_numbers<[2], [1], [1], [2], [0, 0, 0, 1, 1, 2], [0], [0]>} : vector<4x8x8xbf16>, vector<4x8x8xbf16>, vector<4x8x8xf32> -> vector<4x8x8xf32>
    "tpu.trace_stop"() : () -> ()
    %119 = vector.extract_strided_slice %118 {offsets = [0, 0, 0], sizes = [1, 8, 8], strides = [1, 1, 1]} : vector<4x8x8xf32> to vector<1x8x8xf32>
    %120 = vector.shape_cast %119 : vector<1x8x8xf32> to vector<8x8xf32>
    %121 = arith.truncf %120 : vector<8x8xf32> to vector<8x8xbf16>
    %c0_54 = arith.constant 0 : index
    %c0_55 = arith.constant 0 : index
    %122 = vector.load %arg16[%c0_54, %c0_55] : memref<8x32xbf16, #tpu.memory_space<vmem>>, vector<8x8xbf16>
    tpu.vector_store %arg16[%c0_54, %c0_55], %121 {strides = array<i32>} : memref<8x32xbf16, #tpu.memory_space<vmem>>, vector<8x8xbf16>,
    %123 = vector.extract_strided_slice %118 {offsets = [1, 0, 0], sizes = [1, 8, 8], strides = [1, 1, 1]} : vector<4x8x8xf32> to vector<1x8x8xf32>
    %124 = vector.shape_cast %123 : vector<1x8x8xf32> to vector<8x8xf32>
    %125 = arith.truncf %124 : vector<8x8xf32> to vector<8x8xbf16>
    %c0_56 = arith.constant 0 : index
    %c8_57 = arith.constant 8 : index
    %126 = vector.load %arg16[%c0_56, %c8_57] : memref<8x32xbf16, #tpu.memory_space<vmem>>, vector<8x8xbf16>
    tpu.vector_store %arg16[%c0_56, %c8_57], %125 {strides = array<i32>} : memref<8x32xbf16, #tpu.memory_space<vmem>>, vector<8x8xbf16>,
    %127 = vector.extract_strided_slice %118 {offsets = [2, 0, 0], sizes = [1, 8, 8], strides = [1, 1, 1]} : vector<4x8x8xf32> to vector<1x8x8xf32>
    %128 = vector.shape_cast %127 : vector<1x8x8xf32> to vector<8x8xf32>
    %129 = arith.truncf %128 : vector<8x8xf32> to vector<8x8xbf16>
    %c0_58 = arith.constant 0 : index
    %c16 = arith.constant 16 : index
    %130 = vector.load %arg16[%c0_58, %c16] : memref<8x32xbf16, #tpu.memory_space<vmem>>, vector<8x8xbf16>
    tpu.vector_store %arg16[%c0_58, %c16], %129 {strides = array<i32>} : memref<8x32xbf16, #tpu.memory_space<vmem>>, vector<8x8xbf16>,
    %131 = vector.extract_strided_slice %118 {offsets = [3, 0, 0], sizes = [1, 8, 8], strides = [1, 1, 1]} : vector<4x8x8xf32> to vector<1x8x8xf32>
    %132 = vector.shape_cast %131 : vector<1x8x8xf32> to vector<8x8xf32>
    %133 = arith.truncf %132 : vector<8x8xf32> to vector<8x8xbf16>
    %c0_59 = arith.constant 0 : index
    %c24 = arith.constant 24 : index
    %134 = vector.load %arg16[%c0_59, %c24] : memref<8x32xbf16, #tpu.memory_space<vmem>>, vector<8x8xbf16>
    tpu.vector_store %arg16[%c0_59, %c24], %133 {strides = array<i32>} : memref<8x32xbf16, #tpu.memory_space<vmem>>, vector<8x8xbf16>,
    %c0_60 = arith.constant 0 : index
    %c0_61 = arith.constant 0 : index
    %135 = vector.load %arg16[%c0_60, %c0_61] : memref<8x32xbf16, #tpu.memory_space<vmem>>, vector<8x32xbf16>
    %c0_62 = arith.constant 0 : index
    %c0_63 = arith.constant 0 : index
    %136 = vector.load %arg6[%c0_62, %c0_63] : memref<32x32xbf16, #tpu.memory_space<vmem>>, vector<32x32xbf16>
    %cst_64 = arith.constant dense<0.000000e+00> : vector<8x32xf32>
    %137 = tpu.matmul %135, %136, %cst_64 {dimension_numbers = #tpu.dot_dimension_numbers<[1], [0], [0], [1], [0, 0, 1, 1], [], []>} : vector<8x32xbf16>, vector<32x32xbf16>, vector<8x32xf32> -> vector<8x32xf32>
    %c0_65 = arith.constant 0 : index
    %c0_66 = arith.constant 0 : index
    %138 = vector.load %arg7[%c0_65, %c0_66] : memref<1x32xf32, #tpu.memory_space<vmem>>, vector<1x32xf32>
    %139 = vector.broadcast %138 : vector<1x32xf32> to vector<8x32xf32>
    %140 = arith.addf %137, %139 : vector<8x32xf32>
    %141 = arith.addf %28, %140 : vector<8x32xf32>
    %c0_67 = arith.constant 0 : index
    %c0_68 = arith.constant 0 : index
    %142 = vector.load %arg8[%c0_67, %c0_68] : memref<1x32xf32, #tpu.memory_space<vmem>>, vector<1x32xf32>
    %c0_69 = arith.constant 0 : index
    %c0_70 = arith.constant 0 : index
    %143 = vector.load %arg9[%c0_69, %c0_70] : memref<1x32xf32, #tpu.memory_space<vmem>>, vector<1x32xf32>
    %cst_71 = arith.constant dense<0.000000e+00> : vector<8xf32>
    %144 = vector.multi_reduction <add>, %141, %cst_71 [1] : vector<8x32xf32> to vector<8xf32>
    %145 = vector.shape_cast %144 : vector<8xf32> to vector<8x1xf32>
    %cst_72 = arith.constant 3.200000e+01 : f32
    %146 = vector.broadcast %cst_72 : f32 to vector<8x1xf32>
    %147 = arith.divf %145, %146 : vector<8x1xf32>
    %148 = vector.broadcast %147 : vector<8x1xf32> to vector<8x32xf32>
    %149 = arith.subf %141, %148 : vector<8x32xf32>
    %150 = vector.broadcast %147 : vector<8x1xf32> to vector<8x32xf32>
    %151 = arith.subf %141, %150 : vector<8x32xf32>
    %152 = arith.mulf %149, %151 : vector<8x32xf32>
    %cst_73 = arith.constant dense<0.000000e+00> : vector<8xf32>
    %153 = vector.multi_reduction <add>, %152, %cst_73 [1] : vector<8x32xf32> to vector<8xf32>
    %154 = vector.shape_cast %153 : vector<8xf32> to vector<8x1xf32>
    %cst_74 = arith.constant 3.200000e+01 : f32
    %155 = vector.broadcast %cst_74 : f32 to vector<8x1xf32>
    %156 = arith.divf %154, %155 : vector<8x1xf32>
    %157 = vector.broadcast %147 : vector<8x1xf32> to vector<8x32xf32>
    %158 = arith.subf %141, %157 : vector<8x32xf32>
    %cst_75 = arith.constant 9.99999974E-6 : f32
    %159 = vector.broadcast %cst_75 : f32 to vector<8x1xf32>
    %160 = arith.addf %156, %159 : vector<8x1xf32>
    %161 = math.rsqrt %160 : vector<8x1xf32>
    %162 = vector.broadcast %161 : vector<8x1xf32> to vector<8x32xf32>
    %163 = arith.mulf %158, %162 : vector<8x32xf32>
    %164 = vector.broadcast %142 : vector<1x32xf32> to vector<8x32xf32>
    %165 = arith.mulf %163, %164 : vector<8x32xf32>
    %166 = vector.broadcast %143 : vector<1x32xf32> to vector<8x32xf32>
    %167 = arith.addf %165, %166 : vector<8x32xf32>
    %168 = arith.truncf %167 : vector<8x32xf32> to vector<8x32xbf16>
    %c0_76 = arith.constant 0 : index
    %c0_77 = arith.constant 0 : index
    %169 = vector.load %arg10[%c0_76, %c0_77] : memref<32x64xbf16, #tpu.memory_space<vmem>>, vector<32x64xbf16>
    %cst_78 = arith.constant dense<0.000000e+00> : vector<8x64xf32>
    %170 = tpu.matmul %168, %169, %cst_78 {dimension_numbers = #tpu.dot_dimension_numbers<[1], [0], [0], [1], [0, 0, 1, 1], [], []>} : vector<8x32xbf16>, vector<32x64xbf16>, vector<8x64xf32> -> vector<8x64xf32>
    %c0_79 = arith.constant 0 : index
    %c0_80 = arith.constant 0 : index
    %171 = vector.load %arg11[%c0_79, %c0_80] : memref<1x64xf32, #tpu.memory_space<vmem>>, vector<1x64xf32>
    %172 = vector.broadcast %171 : vector<1x64xf32> to vector<8x64xf32>
    %173 = arith.addf %170, %172 : vector<8x64xf32>
    %cst_81 = arith.constant 5.000000e-01 : f32
    %174 = vector.broadcast %cst_81 : f32 to vector<8x64xf32>
    %175 = arith.mulf %174, %173 : vector<8x64xf32>
    %cst_82 = arith.constant 4.471500e-02 : f32
    %176 = vector.broadcast %cst_82 : f32 to vector<8x64xf32>
    %177 = arith.mulf %176, %173 : vector<8x64xf32>
    %178 = arith.mulf %177, %173 : vector<8x64xf32>
    %179 = arith.mulf %178, %173 : vector<8x64xf32>
    %180 = arith.addf %173, %179 : vector<8x64xf32>
    %cst_83 = arith.constant 0.797884583 : f32
    %181 = vector.broadcast %cst_83 : f32 to vector<8x64xf32>
    %182 = arith.mulf %181, %180 : vector<8x64xf32>
    %183 = math.tanh %182 : vector<8x64xf32>
    %cst_84 = arith.constant 1.000000e+00 : f32
    %184 = vector.broadcast %cst_84 : f32 to vector<8x64xf32>
    %185 = arith.addf %184, %183 : vector<8x64xf32>
    %186 = arith.mulf %175, %185 : vector<8x64xf32>
    %187 = arith.truncf %186 : vector<8x64xf32> to vector<8x64xbf16>
    %c0_85 = arith.constant 0 : index
    %c0_86 = arith.constant 0 : index
    %188 = vector.load %arg12[%c0_85, %c0_86] : memref<64x32xbf16, #tpu.memory_space<vmem>>, vector<64x32xbf16>
    %cst_87 = arith.constant dense<0.000000e+00> : vector<8x32xf32>
    %189 = tpu.matmul %187, %188, %cst_87 {dimension_numbers = #tpu.dot_dimension_numbers<[1], [0], [0], [1], [0, 0, 1, 1], [], []>} : vector<8x64xbf16>, vector<64x32xbf16>, vector<8x32xf32> -> vector<8x32xf32>
    %c0_88 = arith.constant 0 : index
    %c0_89 = arith.constant 0 : index
    %190 = vector.load %arg13[%c0_88, %c0_89] : memref<1x32xf32, #tpu.memory_space<vmem>>, vector<1x32xf32>
    %191 = vector.broadcast %190 : vector<1x32xf32> to vector<8x32xf32>
    %192 = arith.addf %189, %191 : vector<8x32xf32>
    %193 = arith.addf %141, %192 : vector<8x32xf32>
    %194 = arith.truncf %193 : vector<8x32xf32> to vector<8x32xbf16>
    %c0_90 = arith.constant 0 : index
    %c0_91 = arith.constant 0 : index
    %c0_92 = arith.constant 0 : index
    %195 = vector.load %arg14[%c0_90, %c0_91, %c0_92] : memref<1x8x32xbf16, #tpu.memory_space<vmem>>, vector<1x8x32xbf16>
    %196 = vector.shape_cast %195 : vector<1x8x32xbf16> to vector<8x32xbf16>
    %197 = vector.shape_cast %194 : vector<8x32xbf16> to vector<1x8x32xbf16>
    tpu.vector_store %arg14[%c0_90, %c0_91, %c0_92], %197 {strides = array<i32>} : memref<1x8x32xbf16, #tpu.memory_space<vmem>>, vector<1x8x32xbf16>,
    return
  }
  func.func @transform_0(%arg0: i32) -> (i32, i32, i32) {
    %c0_i32 = arith.constant 0 : i32
    %c0_i32_0 = arith.constant 0 : i32
    %c0_i32_1 = arith.constant 0 : i32
    return %arg0, %c0_i32, %c0_i32_0 : i32, i32, i32
  }
  func.func @transform_1(%arg0: i32) -> (i32, i32) {
    %c0_i32 = arith.constant 0 : i32
    %c0_i32_0 = arith.constant 0 : i32
    %c0_i32_1 = arith.constant 0 : i32
    return %c0_i32, %c0_i32_0 : i32, i32
  }
  func.func @transform_2(%arg0: i32) -> (i32, i32) {
    %c0_i32 = arith.constant 0 : i32
    %c0_i32_0 = arith.constant 0 : i32
    %c0_i32_1 = arith.constant 0 : i32
    return %c0_i32, %c0_i32_0 : i32, i32
  }
  func.func @transform_3(%arg0: i32) -> (i32, i32) {
    %c0_i32 = arith.constant 0 : i32
    %c0_i32_0 = arith.constant 0 : i32
    %c0_i32_1 = arith.constant 0 : i32
    return %c0_i32, %c0_i32_0 : i32, i32
  }
  func.func @transform_4(%arg0: i32) -> (i32, i32) {
    %c0_i32 = arith.constant 0 : i32
    %c0_i32_0 = arith.constant 0 : i32
    %c0_i32_1 = arith.constant 0 : i32
    return %c0_i32, %c0_i32_0 : i32, i32
  }
  func.func @transform_5(%arg0: i32) -> (i32, i32) {
    %c0_i32 = arith.constant 0 : i32
    %c0_i32_0 = arith.constant 0 : i32
    %c0_i32_1 = arith.constant 0 : i32
    return %c0_i32, %c0_i32_0 : i32, i32
  }
  func.func @transform_6(%arg0: i32) -> (i32, i32) {
    %c0_i32 = arith.constant 0 : i32
    %c0_i32_0 = arith.constant 0 : i32
    %c0_i32_1 = arith.constant 0 : i32
    return %c0_i32, %c0_i32_0 : i32, i32
  }
  func.func @transform_7(%arg0: i32) -> (i32, i32) {
    %c0_i32 = arith.constant 0 : i32
    %c0_i32_0 = arith.constant 0 : i32
    %c0_i32_1 = arith.constant 0 : i32
    return %c0_i32, %c0_i32_0 : i32, i32
  }
  func.func @transform_8(%arg0: i32) -> (i32, i32) {
    %c0_i32 = arith.constant 0 : i32
    %c0_i32_0 = arith.constant 0 : i32
    %c0_i32_1 = arith.constant 0 : i32
    return %c0_i32, %c0_i32_0 : i32, i32
  }
  func.func @transform_9(%arg0: i32) -> (i32, i32) {
    %c0_i32 = arith.constant 0 : i32
    %c0_i32_0 = arith.constant 0 : i32
    %c0_i32_1 = arith.constant 0 : i32
    return %c0_i32, %c0_i32_0 : i32, i32
  }
  func.func @transform_10(%arg0: i32) -> (i32, i32) {
    %c0_i32 = arith.constant 0 : i32
    %c0_i32_0 = arith.constant 0 : i32
    %c0_i32_1 = arith.constant 0 : i32
    return %c0_i32, %c0_i32_0 : i32, i32
  }
  func.func @transform_11(%arg0: i32) -> (i32, i32) {
    %c0_i32 = arith.constant 0 : i32
    %c0_i32_0 = arith.constant 0 : i32
    %c0_i32_1 = arith.constant 0 : i32
    return %c0_i32, %c0_i32_0 : i32, i32
  }
  func.func @transform_12(%arg0: i32) -> (i32, i32) {
    %c0_i32 = arith.constant 0 : i32
    %c0_i32_0 = arith.constant 0 : i32
    %c0_i32_1 = arith.constant 0 : i32
    return %c0_i32, %c0_i32_0 : i32, i32
  }
  func.func @transform_13(%arg0: i32) -> (i32, i32, i32) {
    %c0_i32 = arith.constant 0 : i32
    %c0_i32_0 = arith.constant 0 : i32
    %c0_i32_1 = arith.constant 0 : i32
    return %arg0, %c0_i32, %c0_i32_0 : i32, i32, i32
  }
}

module attributes {stable_mosaic.version = 11 : i64} {
  func.func @head_kernel(%arg0: i32, %arg1: i32, %arg2: memref<16x32xbf16, #tpu.memory_space<vmem>>, %arg3: memref<1x32xf32, #tpu.memory_space<vmem>>, %arg4: memref<1x32xf32, #tpu.memory_space<vmem>>, %arg5: memref<32x128xbf16, #tpu.memory_space<vmem>>, %arg6: memref<1x128xf32, #tpu.memory_space<vmem>>, %arg7: memref<16x128xf32, #tpu.memory_space<vmem>>) attributes {dimension_semantics = [#tpu.dimension_semantics<parallel>, #tpu.dimension_semantics<parallel>], iteration_bounds = array<i64: 1, 1>, scalar_prefetch = 0 : i64, scratch_operands = 0 : i64, tpu.core_type = #tpu.core_type<tc>, window_params = [{transform_indices = @transform_0, window_bounds = array<i64: 16, 32>}, {pipeline_mode = #tpu.pipeline_mode<synchronous>, transform_indices = @transform_1, window_bounds = array<i64: 1, 32>}, {pipeline_mode = #tpu.pipeline_mode<synchronous>, transform_indices = @transform_2, window_bounds = array<i64: 1, 32>}, {transform_indices = @transform_3, window_bounds = array<i64: 32, 128>}, {transform_indices = @transform_4, window_bounds = array<i64: 1, 128>}, {transform_indices = @transform_5, window_bounds = array<i64: 16, 128>}]} {
    %c0 = arith.constant 0 : index
    %c0_0 = arith.constant 0 : index
    %0 = vector.load %arg2[%c0, %c0_0] : memref<16x32xbf16, #tpu.memory_space<vmem>>, vector<16x32xbf16>
    %1 = arith.extf %0 : vector<16x32xbf16> to vector<16x32xf32>
    %c0_1 = arith.constant 0 : index
    %c0_2 = arith.constant 0 : index
    %2 = vector.load %arg3[%c0_1, %c0_2] : memref<1x32xf32, #tpu.memory_space<vmem>>, vector<1x32xf32>
    %c0_3 = arith.constant 0 : index
    %c0_4 = arith.constant 0 : index
    %3 = vector.load %arg4[%c0_3, %c0_4] : memref<1x32xf32, #tpu.memory_space<vmem>>, vector<1x32xf32>
    %cst = arith.constant dense<0.000000e+00> : vector<16xf32>
    %4 = vector.multi_reduction <add>, %1, %cst [1] : vector<16x32xf32> to vector<16xf32>
    %5 = vector.shape_cast %4 : vector<16xf32> to vector<16x1xf32>
    %cst_5 = arith.constant 3.200000e+01 : f32
    %6 = vector.broadcast %cst_5 : f32 to vector<16x1xf32>
    %7 = arith.divf %5, %6 : vector<16x1xf32>
    %8 = vector.broadcast %7 : vector<16x1xf32> to vector<16x32xf32>
    %9 = arith.subf %1, %8 : vector<16x32xf32>
    %10 = vector.broadcast %7 : vector<16x1xf32> to vector<16x32xf32>
    %11 = arith.subf %1, %10 : vector<16x32xf32>
    %12 = arith.mulf %9, %11 : vector<16x32xf32>
    %cst_6 = arith.constant dense<0.000000e+00> : vector<16xf32>
    %13 = vector.multi_reduction <add>, %12, %cst_6 [1] : vector<16x32xf32> to vector<16xf32>
    %14 = vector.shape_cast %13 : vector<16xf32> to vector<16x1xf32>
    %cst_7 = arith.constant 3.200000e+01 : f32
    %15 = vector.broadcast %cst_7 : f32 to vector<16x1xf32>
    %16 = arith.divf %14, %15 : vector<16x1xf32>
    %17 = vector.broadcast %7 : vector<16x1xf32> to vector<16x32xf32>
    %18 = arith.subf %1, %17 : vector<16x32xf32>
    %cst_8 = arith.constant 9.99999974E-6 : f32
    %19 = vector.broadcast %cst_8 : f32 to vector<16x1xf32>
    %20 = arith.addf %16, %19 : vector<16x1xf32>
    %21 = math.rsqrt %20 : vector<16x1xf32>
    %22 = vector.broadcast %21 : vector<16x1xf32> to vector<16x32xf32>
    %23 = arith.mulf %18, %22 : vector<16x32xf32>
    %24 = vector.broadcast %2 : vector<1x32xf32> to vector<16x32xf32>
    %25 = arith.mulf %23, %24 : vector<16x32xf32>
    %26 = vector.broadcast %3 : vector<1x32xf32> to vector<16x32xf32>
    %27 = arith.addf %25, %26 : vector<16x32xf32>
    %28 = arith.truncf %27 : vector<16x32xf32> to vector<16x32xbf16>
    %c0_9 = arith.constant 0 : index
    %c0_10 = arith.constant 0 : index
    %29 = vector.load %arg5[%c0_9, %c0_10] : memref<32x128xbf16, #tpu.memory_space<vmem>>, vector<32x128xbf16>
    %cst_11 = arith.constant dense<0.000000e+00> : vector<16x128xf32>
    %30 = tpu.matmul %28, %29, %cst_11 {dimension_numbers = #tpu.dot_dimension_numbers<[1], [0], [0], [1], [0, 0, 1, 1], [], []>} : vector<16x32xbf16>, vector<32x128xbf16>, vector<16x128xf32> -> vector<16x128xf32>
    %c0_12 = arith.constant 0 : index
    %c0_13 = arith.constant 0 : index
    %31 = vector.load %arg6[%c0_12, %c0_13] : memref<1x128xf32, #tpu.memory_space<vmem>>, vector<1x128xf32>
    %32 = vector.broadcast %31 : vector<1x128xf32> to vector<16x128xf32>
    %33 = arith.addf %30, %32 : vector<16x128xf32>
    %c0_14 = arith.constant 0 : index
    %c0_15 = arith.constant 0 : index
    %34 = vector.load %arg7[%c0_14, %c0_15] : memref<16x128xf32, #tpu.memory_space<vmem>>, vector<16x128xf32>
    tpu.vector_store %arg7[%c0_14, %c0_15], %33 {strides = array<i32>} : memref<16x128xf32, #tpu.memory_space<vmem>>, vector<16x128xf32>,
    return
  }
  func.func @transform_0(%arg0: i32, %arg1: i32) -> (i32, i32) {
    %c0_i32 = arith.constant 0 : i32
    %c0_i32_0 = arith.constant 0 : i32
    return %arg0, %c0_i32 : i32, i32
  }
  func.func @transform_1(%arg0: i32, %arg1: i32) -> (i32, i32) {
    %c0_i32 = arith.constant 0 : i32
    %c0_i32_0 = arith.constant 0 : i32
    %c0_i32_1 = arith.constant 0 : i32
    return %c0_i32, %c0_i32_0 : i32, i32
  }
  func.func @transform_2(%arg0: i32, %arg1: i32) -> (i32, i32) {
    %c0_i32 = arith.constant 0 : i32
    %c0_i32_0 = arith.constant 0 : i32
    %c0_i32_1 = arith.constant 0 : i32
    return %c0_i32, %c0_i32_0 : i32, i32
  }
  func.func @transform_3(%arg0: i32, %arg1: i32) -> (i32, i32) {
    %c0_i32 = arith.constant 0 : i32
    %c0_i32_0 = arith.constant 0 : i32
    return %c0_i32, %arg1 : i32, i32
  }
  func.func @transform_4(%arg0: i32, %arg1: i32) -> (i32, i32) {
    %c0_i32 = arith.constant 0 : i32
    %c0_i32_0 = arith.constant 0 : i32
    return %c0_i32, %arg1 : i32, i32
  }
  func.func @transform_5(%arg0: i32, %arg1: i32) -> (i32, i32) {
    %c0_i32 = arith.constant 0 : i32
    return %arg0, %arg1 : i32, i32
  }
}

</mosaic_0001>

<bundles_post_ra>
// kernel: gpt_forward.5
= control target key start
LH: loop header
LB: loop body
LE: loop exit
PB: predicated region body
PF: predicated region fallthrough
CT: control target
= control target key end

     0   :  { %10 = vsyncpa [#allocation3], 0  ;;  %s521_s0 = inlined_call_operand.hbm [shape: bf16[16,32], index: 0, kind: input, shape index: {}]   ;;  %s522_s1 = inlined_call_operand.hbm [shape: f32[1,32], index: 1, kind: input, shape index: {}]   ;;  %s523_s2 = inlined_call_operand.hbm [shape: f32[1,32], index: 2, kind: input, shape index: {}]   ;;  %s524_s3 = inlined_call_operand.hbm [shape: bf16[32,128], index: 3, kind: input, shape index: {}]   ;;  %s525_s4 = inlined_call_operand.hbm [shape: f32[1,128], index: 4, kind: input, shape index: {}]   ;;  %s526_s5 = inlined_call_operand.hbm [shape: f32[16,128], index: 5, kind: output, shape index: {}]  }
   0x1   :  { %11 = vsyncpa [#allocation6], 0 }
   0x2   :  { %12 = vsyncpa [#allocation9], 0 }
   0x3   :  { %13 = vsyncpa [#allocation4], 0  ;;  %s402_s18 = smov [#allocation5]   ;;  %s262_s22 = scalar_lea.hbm %s522_s1, 16 }
   0x4   :  { %s32_s19 = sshll.u32 %s402_s18, 4  ;;  %p263_p0 = scmp.ne.s32.totalorder %s522_s1, %s262_s22  ;;  %s33_s19 = int_to_ptr.vmem [resolvable:$true] %s32_s19 }
   0x5   :  { %p266_p1 = scmp.lt.u32.totalorder %s262_s22, %s522_s1 }
   0x7   :  { %p268_p2 = pnand %p266_p1, %p263_p0 }
   0x9   :  { %271 = shalt.err (!%p268_p2)
}
   0xa   :  { %s272_s27 = scalar_lea.vmem %s33_s19, 16  ;;  %s276_s28 = scalar_lea.vmem %s33_s19, 32 }
   0xb   :  { %p273_p3 = scmp.ne.s32.totalorder %s33_s19, %s272_s27  ;;  %p277_p4 = scmp.lt.s32.totalorder %s33_s19, %s33_s19 }
   0xc   :  { %p278_p5 = scmp.lt.s32.totalorder %s276_s28, %s272_s27 }
   0xe   :  { %p279_p6 = por %p278_p5, %p277_p4 }
  0x10   :  { %p280_p7 = pnand %p279_p6, %p273_p3 }
  0x12   :  { %283 = shalt.err (!%p280_p7)
}
  0x13   :  { %35 = dma.hbm_to_vmem [thread:$0]  %s522_s1, 16, %s33_s19, [#allocation6]  }
  0x14   :  { %s403_s6 = smov [#allocation8]   ;;  %s404_s8 = smov [#allocation2]  }
  0x15   :  { %s51_s7 = sshll.u32 %s403_s6, 4  ;;  %s19_s9 = sshll.u32 %s404_s8, 4  ;;  %s52_s7 = int_to_ptr.vmem [resolvable:$true] %s51_s7  ;;  %s20_s9 = int_to_ptr.vmem [resolvable:$true] %s19_s9 }
  0x16   :  { %s284_s12 = scalar_lea.hbm %s524_s3, 256 }
  0x17   :  { %p285_p8 = scmp.ne.s32.totalorder %s524_s3, %s284_s12  ;;  %p288_p9 = scmp.lt.u32.totalorder %s284_s12, %s524_s3 }
  0x19   :  { %p290_p10 = pnand %p288_p9, %p285_p8 }
  0x1b   :  { %293 = shalt.err (!%p290_p10)
}
  0x1c   :  { %s294_s1 = scalar_lea.vmem %s52_s7, 256  ;;  %p299_p12 = scmp.lt.s32.totalorder %s52_s7, %s52_s7 }
  0x1d   :  { %p295_p11 = scmp.ne.s32.totalorder %s52_s7, %s294_s1  ;;  %p300_p13 = scmp.lt.s32.totalorder %s294_s1, %s294_s1 }
  0x1f   :  { %p301_p0 = por %p300_p13, %p299_p12 }
  0x21   :  { %p302_p1 = pnand %p301_p0, %p295_p11 }
  0x23   :  { %305 = shalt.err (!%p302_p1)
}
  0x24   :  { %s405_s17 = smov 64   ;;  %s406_s18 = smov 4  }
  0x25   :  { %57 = dma.hbm_to_vmem [thread:$0]  %s524_s3, 256, %s52_s7, [#allocation9], %s405_s17, %s405_s17, %s406_s18  }
  0x26   :  { %s306_s23 = scalar_lea.hbm %s521_s0, 128 }
  0x27   :  { %p307_p2 = scmp.ne.s32.totalorder %s521_s0, %s306_s23  ;;  %p310_p3 = scmp.lt.u32.totalorder %s306_s23, %s521_s0 }
  0x29   :  { %p312_p4 = pnand %p310_p3, %p307_p2 }
  0x2b   :  { %315 = shalt.err (!%p312_p4)
}
  0x2c   :  { %s316_s28 = scalar_lea.vmem %s20_s9, 128  ;;  %p321_p6 = scmp.lt.s32.totalorder %s20_s9, %s20_s9 }
  0x2d   :  { %p317_p5 = scmp.ne.s32.totalorder %s20_s9, %s316_s28  ;;  %p322_p7 = scmp.lt.s32.totalorder %s316_s28, %s316_s28 }
  0x2f   :  { %p323_p8 = por %p322_p7, %p321_p6 }
  0x31   :  { %p324_p9 = pnand %p323_p8, %p317_p5 }
  0x33   :  { %327 = shalt.err (!%p324_p9)
}
  0x34   :  { %25 = dma.hbm_to_vmem [thread:$0]  %s521_s0, 128, %s20_s9, [#allocation3], %s405_s17, %s405_s17, %s406_s18  }
  0x35   :  { %s407_s30 = smov [#allocation7]   ;;  %s408_s7 = smov [#allocation10]  }
  0x36   :  { %s42_s6 = sshll.u32 %s407_s30, 4  ;;  %s64_s8 = sshll.u32 %s408_s7, 4  ;;  %s43_s6 = int_to_ptr.vmem [resolvable:$true] %s42_s6  ;;  %s65_s8 = int_to_ptr.vmem [resolvable:$true] %s64_s8 }
  0x37   :  { %s328_s12 = scalar_lea.hbm %s523_s2, 16 }
  0x38   :  { %p329_p10 = scmp.ne.s32.totalorder %s523_s2, %s328_s12  ;;  %p332_p11 = scmp.lt.u32.totalorder %s328_s12, %s523_s2 }
  0x3a   :  { %p334_p12 = pnand %p332_p11, %p329_p10 }
  0x3c   :  { %337 = shalt.err (!%p334_p12)
}
  0x3d   :  { %s338_s0 = scalar_lea.vmem %s43_s6, 16  ;;  %s342_s9 = scalar_lea.vmem %s43_s6, 32 }
  0x3e   :  { %p339_p13 = scmp.ne.s32.totalorder %s43_s6, %s338_s0  ;;  %p343_p0 = scmp.lt.s32.totalorder %s43_s6, %s43_s6 }
  0x3f   :  { %p344_p1 = scmp.lt.s32.totalorder %s342_s9, %s338_s0 }
  0x41   :  { %p345_p2 = por %p344_p1, %p343_p0 }
  0x43   :  { %p346_p3 = pnand %p345_p2, %p339_p13 }
  0x45   :  { %349 = shalt.err (!%p346_p3)
}
  0x46   :  { %45 = dma.hbm_to_vmem [thread:$0]  %s523_s2, 16, %s43_s6, [#allocation6]  }
  0x47   :  { %s350_s20 = scalar_lea.hbm %s525_s4, 16 }
  0x48   :  { %p351_p4 = scmp.ne.s32.totalorder %s525_s4, %s350_s20  ;;  %p354_p5 = scmp.lt.u32.totalorder %s350_s20, %s525_s4 }
  0x4a   :  { %p356_p6 = pnand %p354_p5, %p351_p4 }
  0x4c   :  { %359 = shalt.err (!%p356_p6)
}
  0x4d   :  { %s360_s25 = scalar_lea.vmem %s65_s8, 16  ;;  %s364_s26 = scalar_lea.vmem %s65_s8, 32 }
  0x4e   :  { %p361_p7 = scmp.ne.s32.totalorder %s65_s8, %s360_s25  ;;  %p365_p8 = scmp.lt.s32.totalorder %s65_s8, %s65_s8 }
  0x4f   :  { %p366_p9 = scmp.lt.s32.totalorder %s364_s26, %s360_s25 }
  0x51   :  { %p367_p10 = por %p366_p9, %p365_p8 }
  0x53   :  { %p368_p11 = pnand %p367_p10, %p361_p7 }
  0x55   :  { %371 = shalt.err (!%p368_p11)
}
  0x56   :  { %67 = dma.hbm_to_vmem [thread:$0]  %s525_s4, 16, %s65_s8, [#allocation9]  }
  0x57   :  { %394 = dma.done.wait [#allocation3], 128  }
  0x58   :  { %395 = vsyncadd [#allocation3], 4294967168 }
  0x59   :  { %396 = dma.done.wait [#allocation6], 32  }
  0x5a   :  { %397 = vsyncadd [#allocation6], 4294967264 }
  0x5b   :  { %398 = dma.done.wait [#allocation9], 272  }
  0x5c   :  { %399 = vsyncadd [#allocation9], 4294967024  ;;  %v230_v0 = vld [vmem:[#allocation2] sm:$0xff]   ;;  %vm90_vm0 = vcmask 261120   ;;  %v256_v15 = vld [vmem:[#allocation8] sm:$0xff]   ;;  %v409_v16 = vmov 0.0  }
  0x5d   :  { %v231_v1 = vunpack.c.l.bf16 %v230_v0  ;;  %v232_v2 = vunpack.c.h.bf16 %v230_v0  ;;  %236 = vmatprep.subr.bf16.mxu0 %v409_v16  ;;  %v257_v17 = vld [vmem:[#allocation8 + $0x8] sm:$0xff]   ;;  %vm410_vm1 = vmmov 0   ;;  %v223_v26 = vld [vmem:[#allocation5] ss:$0 sm:$0xff]  ;;  %v224_v30 = vld [vmem:[#allocation7] ss:$0 sm:$0xff] }
  0x5e   :  { %237 = vmatpush3.bf16.msra.mxu0 %v256_v15  ;;  %240 = vmatprep.mubr.msk.bf16.mxu0 %vm410_vm1, %v409_v16  ;;  %v225_v35 = vld [vmem:[#allocation10] ss:$0 sm:$0xff]  ;;  %s411_s4 = smov [#allocation11]  }
  0x5f   :  { %v91_v3 = vsel %vm90_vm0, %v231_v1, 0.0  ;;  %v94_v4 = vsel %vm90_vm0, %v232_v2, 0.0  ;;  %238 = vmatprep.subr.bf16.mxu0 %v409_v16  ;;  %s209_s28 = sshll.u32 %s411_s4, 4  ;;  %s210_s28 = int_to_ptr.vmem [resolvable:$true] %s209_s28 }
  0x60   :  { %92 = vadd.xlane.f32.xlu0 %v91_v3  ;;  %s372_s3 = scalar_lea.vmem %s210_s28, 256  ;;  %p377_p13 = scmp.lt.s32.totalorder %s210_s28, %s210_s28 }
  0x61   :  { %p373_p12 = scmp.ne.s32.totalorder %s210_s28, %s372_s3  ;;  %p378_p0 = scmp.lt.s32.totalorder %s372_s3, %s372_s3 }
  0x62   :  { %239 = vmatpush3.bf16.msra.mxu0 %v257_v17 }
  0x63   :  { %p379_p1 = por %p378_p0, %p377_p13 }
  0x64   :  { %95 = vadd.xlane.f32.xlu0 %v94_v4 }
  0x65   :  { %p380_p2 = pnand %p379_p1, %p373_p12 }
  0xed   :  { %v93_v5 = vpop.xlane.xlu0 %92 }
  0xee   :  { %v98_v6 = vmul.f32 0.03125, %v93_v5 }
  0xf0   :  { %v100_v7 = vsub.f32 %v231_v1, %v98_v6 }
  0xf1   :  { %v96_v8 = vpop.xlane.xlu0 %95 }
  0xf2   :  { %v99_v9 = vmul.f32 0.03125, %v96_v8  ;;  %v102_v10 = vmul.f32 %v100_v7, %v100_v7 }
  0xf4   :  { %v101_v11 = vsub.f32 %v232_v2, %v99_v9  ;;  %v104_v12 = vsel %vm90_vm0, %v102_v10, 0.0 }
  0xf5   :  { %105 = vadd.xlane.f32.xlu1 %v104_v12 }
  0xf6   :  { %v103_v13 = vmul.f32 %v101_v11, %v101_v11 }
  0xf8   :  { %v107_v14 = vsel %vm90_vm0, %v103_v13, 0.0 }
  0xf9   :  { %108 = vadd.xlane.f32.xlu1 %v107_v14 }
 0x182   :  { %v106_v18 = vpop.xlane.xlu1 %105 }
 0x183   :  { %v110_v19 = vmul.f32 0.03125, %v106_v18 }
 0x185   :  { %v112_v20 = vadd.f32 1e-05, %v110_v19 }
 0x186   :  { %v109_v21 = vpop.xlane.xlu1 %108 }
 0x187   :  { %258 = vrsqrt.f32 %v112_v20  ;;  %v111_v22 = vmul.f32 0.03125, %v109_v21 }
 0x189   :  { %v113_v23 = vadd.f32 1e-05, %v111_v22 }
 0x18b   :  { %260 = vrsqrt.f32 %v113_v23 }
 0x191   :  { %v259_v24 = vpop.eup %258 }
 0x192   :  { %v116_v25 = vmul.f32 %v259_v24, %v100_v7 }
 0x194   :  { %v124_v29 = vmul.f32 %v223_v26, %v116_v25 }
 0x195   :  { %v261_v27 = vpop.eup %260 }
 0x196   :  { %v117_v28 = vmul.f32 %v261_v27, %v101_v11  ;;  %v132_v32 = vadd.f32 %v224_v30, %v124_v29 }
 0x198   :  { %v125_v31 = vmul.f32 %v223_v26, %v117_v28 }
 0x19a   :  { %v133_v33 = vadd.f32 %v224_v30, %v125_v31 }
 0x19c   :  { %v134_v34 = vpack.c.bf16 %v133_v33, %v132_v32 }
 0x19e   :  { %241 = vmatmul.mubr.msk.bf16.vlgmr.msra.gmra.mrb[0].mxu0 %vm90_vm0, %v134_v34 }
 0x271   :  { %v195_v36 = vpop.f32.mrb[0].mxu0 }
 0x272   :  { %v196_v37 = vadd.f32 %v225_v35, %v195_v36  ;;  %v242_v38 = vpop.f32.mrb[1].mxu0 }
 0x273   :  { %v198_v39 = vpop.f32.mrb[2].mxu0 }
 0x274   :  { %202 = vst [vmem:[#allocation11] sm:$0xff] %v196_v37  ;;  %v199_v40 = vadd.f32 %v225_v35, %v198_v39  ;;  %v243_v41 = vpop.f32.mrb[3].mxu0 }
 0x276   :  { %203 = vst [vmem:[#allocation11 + $0x8] sm:$0xff] %v199_v40 }
 0x277   :  { %383 = shalt.err (!%p380_p2)
}
 0x278   :  { %s384_s6 = scalar_lea.hbm %s526_s5, 256 }
 0x279   :  { %p385_p3 = scmp.ne.s32.totalorder %s526_s5, %s384_s6  ;;  %p388_p4 = scmp.lt.u32.totalorder %s384_s6, %s526_s5 }
 0x27b   :  { %p390_p5 = pnand %p388_p4, %p385_p3 }
 0x27d   :  { %393 = shalt.err (!%p390_p5)
}
 0x27e   :  { %s412_s12 = smov 128   ;;  %s413_s13 = smov 8  }
 0x27f   :  { %215 = dma.vmem_to_hbm [thread:$0]  %s210_s28, 256, %s526_s5, [#allocation4], %s412_s12, %s412_s12, %s413_s13  }
 0x280   :  { %400 = dma.done.wait [#allocation4], 256  }
 0x281   :  { %401 = vsyncadd [#allocation4], 4294967040 }
 0x282   :  { %219 = vsyncpa [#allocation3], 1 }
 0x283   :  { %220 = vsyncpa [#allocation6], 1 }
 0x284   :  { %221 = vsyncpa [#allocation9], 1 }
 0x285   :  { %222 = vsyncpa [#allocation4], 1 }

// kernel: gpt_forward.3
= control target key start
LH: loop header
LB: loop body
LE: loop exit
PB: predicated region body
PF: predicated region fallthrough
CT: control target
= control target key end

     0   :  { %s3241_s0 = inlined_call_operand.hbm [shape: bf16[2,8,32], index: 0, kind: input, shape index: {}]   ;;  %s3242_s1 = inlined_call_operand.hbm [shape: f32[1,32], index: 1, kind: input, shape index: {}]   ;;  %s3243_s2 = inlined_call_operand.hbm [shape: f32[1,32], index: 2, kind: input, shape index: {}]   ;;  %s3244_s3 = inlined_call_operand.hbm [shape: bf16[32,96], index: 3, kind: input, shape index: {}]   ;;  %s3245_s4 = inlined_call_operand.hbm [shape: f32[1,96], index: 4, kind: input, shape index: {}]   ;;  %s3246_s5 = inlined_call_operand.hbm [shape: bf16[32,32], index: 5, kind: input, shape index: {}]   ;;  %s3247_s6 = inlined_call_operand.hbm [shape: f32[1,32], index: 6, kind: input, shape index: {}]   ;;  %s3248_s7 = inlined_call_operand.hbm [shape: f32[1,32], index: 7, kind: input, shape index: {}]   ;;  %s3249_s8 = inlined_call_operand.hbm [shape: f32[1,32], index: 8, kind: input, shape index: {}]   ;;  %s3250_s9 = inlined_call_operand.hbm [shape: bf16[32,64], index: 9, kind: input, shape index: {}]   ;;  %s3251_s10 = inlined_call_operand.hbm [shape: f32[1,64], index: 10, kind: input, shape index: {}]   ;;  %s3252_s11 = inlined_call_operand.hbm [shape: bf16[64,32], index: 11, kind: input, shape index: {}]   ;;  %s3253_s12 = inlined_call_operand.hbm [shape: f32[1,32], index: 12, kind: input, shape index: {}]   ;;  %s3254_s13 = inlined_call_operand.hbm [shape: bf16[2,8,32], index: 13, kind: output, shape index: {}]  }
   0x1   :  { %3264 = sst [smem:[#allocation36_spill]] %s3241_s0 }
   0x2   :  { %3265 = sst [smem:[#allocation37_spill]] %s3242_s1 }
   0x3   :  { %3266 = sst [smem:[#allocation38_spill]] %s3243_s2 }
   0x4   :  { %3267 = sst [smem:[#allocation39_spill]] %s3244_s3 }
   0x5   :  { %3268 = sst [smem:[#allocation40_spill]] %s3254_s13 }
   0x6   :  { %18 = vsyncpa [#allocation5], 0 }
   0x7   :  { %20 = vsyncpa [#allocation5 + $0x1], 0 }
   0x8   :  { %21 = vsyncpa [#allocation8], 0 }
   0x9   :  { %22 = vsyncpa [#allocation11], 0 }
   0xa   :  { %23 = vsyncpa [#allocation14], 0 }
   0xb   :  { %24 = vsyncpa [#allocation17], 0 }
   0xc   :  { %25 = vsyncpa [#allocation20], 0 }
   0xd   :  { %26 = vsyncpa [#allocation23], 0 }
   0xe   :  { %27 = vsyncpa [#allocation6], 0 }
   0xf   :  { %29 = vsyncpa [#allocation6 + $0x1], 0  ;;  %s2670_s25 = smov 0   ;;  %s2672_s26 = smov 0  }
  0x10   :  { %s2674_s27 = smov 0   ;;  %s2676_s28 = smov 0  }
  0x11 LB: > { %s2568_s29 = smov [#allocation7]   ;;  %s2691_s14 = sadd.s32 4294967295, %s2566_s28   ;;  %s2566_s28 = sphi %s2676_s28, %s3307_s28   ;;  %s2562_s27 = sphi %s2674_s27, %s3306_s27   ;;  %s2558_s26 = sphi %s2672_s26, %s3305_s26   ;;  %s2554_s25 = sphi %s2670_s25, %s3304_s25  }
  0x12   : > { %s357_s30 = sshll.u32 %s2568_s29, 4  ;;  %3269 = sst [smem:[#allocation34_spill]] %s2691_s14  ;;  %s2696_s30 = int_to_ptr.vmem [resolvable:$true] %s357_s30 }
  0x13   : > { %p1706_p0 = scmp.ge.s32.totalorder %s2566_s28, 1  ;;  %p3261_p1 = scmp.eq.s32.totalorder %s2691_s14, 0 }
  0x14   : > { %p344_p2 = scmp.lt.s32.totalorder %s2566_s28, 3  ;;  %s2569_s16 = smov [#allocation10]  }
  0x15   : > { %s378_s17 = sshll.u32 %s2569_s16, 4  ;;  %s2570_s19 = smov [#allocation13]   ;;  %s2705_s17 = int_to_ptr.vmem [resolvable:$true] %s378_s17 }
  0x16   : > { %p2698_p3 = pnand %p1706_p0, %p344_p2  ;;  %s402_s20 = sshll.u32 %s2570_s19, 4  ;;  %s2713_s20 = int_to_ptr.vmem [resolvable:$true] %s402_s20 }
  0x17   : > { %s3273_s1 = sld [smem:[#allocation37_spill]] }
  0x18   : > { %s3270_s15 = scalar_select %p2698_p3, 1, 0 }
  0x19   : > { %p1945_p5 = pneg %p2698_p3 }
  0x1a   : > { %3271 = sst [smem:[#allocation35_spill]] %s3270_s15 }
  0x1b   : > { %p2709_p6 = pnand %p1945_p5, %p3261_p1 }
  0x1d   : > { %s2110_s23 = scalar_lea.hbm %s3273_s1, 16  ;;  %p2723_p8 = pneg %p2709_p6 }
  0x1e   : > { %p2111_p7 = scmp.ne.s32.totalorder %s3273_s1, %s2110_s23  ;;  %p2117_p11 = scmp.lt.u32.totalorder %s2110_s23, %s3273_s1 }
  0x20   : > { %p2113_p9 = pnand %p2723_p8, %p2111_p7 }
  0x22   : > { %p2114_p10 = pneg %p2113_p9 }
  0x24   : > { %p2119_p12 = pnand %p2117_p11, %p2114_p10 }
  0x26   : > { %2122 = shalt.err (!%p2119_p12)
}
  0x27   : > { %s2123_s21 = scalar_lea.vmem %s2696_s30, 16  ;;  %s2130_s22 = scalar_lea.vmem %s2696_s30, 32 }
  0x28   : > { %p2124_p13 = scmp.ne.s32.totalorder %s2696_s30, %s2123_s21  ;;  %p2131_p5 = scmp.lt.s32.totalorder %s2696_s30, %s2696_s30 }
  0x29   : > { %p2132_p7 = scmp.lt.s32.totalorder %s2130_s22, %s2123_s21 }
  0x2a   : > { %p2126_p0 = pnand %p2124_p13, %p2723_p8 }
  0x2b   : > { %p2133_p9 = por %p2132_p7, %p2131_p5 }
  0x2c   : > { %p2127_p2 = pneg %p2126_p0 }
  0x2e   : > { %p2134_p4 = pnand %p2133_p9, %p2127_p2 }
  0x30   : > { %2137 = shalt.err (!%p2134_p4)
}
  0x31   : > { %1948 = dma.hbm_to_vmem [thread:$0]  (!%p2709_p6), %s3273_s1, 16, %s2696_s30, [#allocation8]  }
  0x32   : > { %s3275_s3 = sld [smem:[#allocation39_spill]] }
  0x38   : > { %s2138_s19 = scalar_lea.hbm %s3275_s3, 256 }
  0x39   : > { %p2139_p10 = scmp.ne.s32.totalorder %s3275_s3, %s2138_s19  ;;  %p2145_p4 = scmp.lt.u32.totalorder %s2138_s19, %s3275_s3 }
  0x3b   : > { %p2141_p11 = pnand %p2139_p10, %p2723_p8 }
  0x3d   : > { %p2142_p12 = pneg %p2141_p11 }
  0x3f   : > { %p2147_p13 = pnand %p2145_p4, %p2142_p12 }
  0x41   : > { %2150 = shalt.err (!%p2147_p13)
}
  0x42   : > { %s2151_s30 = scalar_lea.vmem %s2705_s17, 256  ;;  %p2159_p7 = scmp.lt.s32.totalorder %s2705_s17, %s2705_s17 }
  0x43   : > { %p2152_p0 = scmp.ne.s32.totalorder %s2705_s17, %s2151_s30  ;;  %p2160_p9 = scmp.lt.s32.totalorder %s2151_s30, %s2151_s30 }
  0x45   : > { %p2154_p2 = pnand %p2152_p0, %p2723_p8  ;;  %p2161_p10 = por %p2160_p9, %p2159_p7 }
  0x47   : > { %p2155_p5 = pneg %p2154_p2 }
  0x49   : > { %p2162_p11 = pnand %p2161_p10, %p2155_p5 }
  0x4b   : > { %2165 = shalt.err (!%p2162_p11)
}
  0x4c   : > { %s2571_s0 = smov 64   ;;  %s2572_s15 = smov 4  }
  0x4d   : > { %1954 = dma.hbm_to_vmem [thread:$0]  (!%p2709_p6), %s3275_s3, 256, %s2705_s17, [#allocation11], %s2571_s0, %s2571_s0, %s2572_s15  }
  0x4e   : > { %s2166_s19 = scalar_lea.hbm %s3246_s5, 256 }
  0x4f   : > { %p2167_p12 = scmp.ne.s32.totalorder %s3246_s5, %s2166_s19  ;;  %p2173_p0 = scmp.lt.u32.totalorder %s2166_s19, %s3246_s5 }
  0x51   : > { %p2169_p4 = pnand %p2167_p12, %p2723_p8 }
  0x53   : > { %p2170_p13 = pneg %p2169_p4 }
  0x55   : > { %p2175_p2 = pnand %p2173_p0, %p2170_p13 }
  0x57   : > { %2178 = shalt.err (!%p2175_p2)
}
  0x58   : > { %s2179_s17 = scalar_lea.vmem %s2713_s20, 256  ;;  %p2187_p10 = scmp.lt.s32.totalorder %s2713_s20, %s2713_s20 }
  0x59   : > { %p2180_p5 = scmp.ne.s32.totalorder %s2713_s20, %s2179_s17  ;;  %p2188_p11 = scmp.lt.s32.totalorder %s2179_s17, %s2179_s17 }
  0x5b   : > { %p2182_p7 = pnand %p2180_p5, %p2723_p8  ;;  %p2189_p12 = por %p2188_p11, %p2187_p10 }
  0x5d   : > { %p2183_p9 = pneg %p2182_p7 }
  0x5f   : > { %p2190_p4 = pnand %p2189_p12, %p2183_p9 }
  0x61   : > { %2193 = shalt.err (!%p2190_p4)
}
  0x62   : > { %1960 = dma.hbm_to_vmem [thread:$0]  (!%p2709_p6), %s3246_s5, 256, %s2713_s20, [#allocation14], %s2571_s0, %s2571_s0, %s2572_s15  }
  0x63   : > { %s2573_s23 = smov [#allocation16]   ;;  %s2574_s29 = smov [#allocation19]  }
  0x64   : > { %s427_s24 = sshll.u32 %s2573_s23, 4  ;;  %s448_s19 = sshll.u32 %s2574_s29, 4  ;;  %s428_s24 = int_to_ptr.vmem [resolvable:$true] %s427_s24  ;;  %s449_s19 = int_to_ptr.vmem [resolvable:$true] %s448_s19 }
  0x65   : > { %s2194_s30 = scalar_lea.hbm %s3248_s7, 16 }
  0x66   : > { %p2195_p13 = scmp.ne.s32.totalorder %s3248_s7, %s2194_s30  ;;  %p2201_p5 = scmp.lt.u32.totalorder %s2194_s30, %s3248_s7 }
  0x68   : > { %p2197_p0 = pnand %p2195_p13, %p2723_p8 }
  0x6a   : > { %p2198_p2 = pneg %p2197_p0 }
  0x6c   : > { %p2203_p7 = pnand %p2201_p5, %p2198_p2 }
  0x6e   : > { %2206 = shalt.err (!%p2203_p7)
}
  0x6f   : > { %s2207_s20 = scalar_lea.vmem %s428_s24, 16  ;;  %s2214_s13 = scalar_lea.vmem %s428_s24, 32 }
  0x70   : > { %p2208_p9 = scmp.ne.s32.totalorder %s428_s24, %s2207_s20  ;;  %p2215_p12 = scmp.lt.s32.totalorder %s428_s24, %s428_s24 }
  0x71   : > { %p2216_p4 = scmp.lt.s32.totalorder %s2214_s13, %s2207_s20 }
  0x72   : > { %p2210_p10 = pnand %p2208_p9, %p2723_p8 }
  0x73   : > { %p2217_p1 = por %p2216_p4, %p2215_p12 }
  0x74   : > { %p2211_p11 = pneg %p2210_p10 }
  0x76   : > { %p2218_p3 = pnand %p2217_p1, %p2211_p11 }
  0x78   : > { %2221 = shalt.err (!%p2218_p3)
}
  0x79   : > { %1966 = dma.hbm_to_vmem [thread:$0]  (!%p2709_p6), %s3248_s7, 16, %s428_s24, [#allocation17]  }
  0x7a   : > { %s2222_s21 = scalar_lea.hbm %s3250_s9, 256 }
  0x7b   : > { %p2223_p13 = scmp.ne.s32.totalorder %s3250_s9, %s2222_s21  ;;  %p2229_p3 = scmp.lt.u32.totalorder %s2222_s21, %s3250_s9 }
  0x7d   : > { %p2225_p0 = pnand %p2223_p13, %p2723_p8 }
  0x7f   : > { %p2226_p1 = pneg %p2225_p0 }
  0x81   : > { %p2231_p2 = pnand %p2229_p3, %p2226_p1 }
  0x83   : > { %2234 = shalt.err (!%p2231_p2)
}
  0x84   : > { %s2235_s20 = scalar_lea.vmem %s449_s19, 256  ;;  %p2243_p10 = scmp.lt.s32.totalorder %s449_s19, %s449_s19 }
  0x85   : > { %p2236_p5 = scmp.ne.s32.totalorder %s449_s19, %s2235_s20  ;;  %p2244_p11 = scmp.lt.s32.totalorder %s2235_s20, %s2235_s20 }
  0x87   : > { %p2238_p7 = pnand %p2236_p5, %p2723_p8  ;;  %p2245_p12 = por %p2244_p11, %p2243_p10 }
  0x89   : > { %p2239_p9 = pneg %p2238_p7 }
  0x8b   : > { %p2246_p4 = pnand %p2245_p12, %p2239_p9 }
  0x8d   : > { %2249 = shalt.err (!%p2246_p4)
}
  0x8e   : > { %1972 = dma.hbm_to_vmem [thread:$0]  (!%p2709_p6), %s3250_s9, 256, %s449_s19, [#allocation20], %s2571_s0, %s2571_s0, %s2572_s15  }
  0x8f   : > { %s2575_s3 = smov [#allocation22]   ;;  %s2576_s14 = smov [#allocation9]  }
  0x90   : > { %s472_s23 = sshll.u32 %s2575_s3, 4  ;;  %s368_s29 = sshll.u32 %s2576_s14, 4  ;;  %s473_s23 = int_to_ptr.vmem [resolvable:$true] %s472_s23  ;;  %s369_s29 = int_to_ptr.vmem [resolvable:$true] %s368_s29 }
  0x91   : > { %s2250_s30 = scalar_lea.hbm %s3252_s11, 512 }
  0x92   : > { %p2251_p13 = scmp.ne.s32.totalorder %s3252_s11, %s2250_s30  ;;  %p2257_p3 = scmp.lt.u32.totalorder %s2250_s30, %s3252_s11 }
  0x94   : > { %p2253_p0 = pnand %p2251_p13, %p2723_p8 }
  0x96   : > { %p2254_p1 = pneg %p2253_p0 }
  0x98   : > { %p2259_p2 = pnand %p2257_p3, %p2254_p1 }
  0x9a   : > { %2262 = shalt.err (!%p2259_p2)
}
  0x9b   : > { %s2263_s19 = scalar_lea.vmem %s473_s23, 512  ;;  %p2271_p10 = scmp.lt.s32.totalorder %s473_s23, %s473_s23 }
  0x9c   : > { %p2264_p5 = scmp.ne.s32.totalorder %s473_s23, %s2263_s19  ;;  %p2272_p11 = scmp.lt.s32.totalorder %s2263_s19, %s2263_s19 }
  0x9e   : > { %p2266_p7 = pnand %p2264_p5, %p2723_p8  ;;  %p2273_p12 = por %p2272_p11, %p2271_p10 }
  0xa0   : > { %p2267_p9 = pneg %p2266_p7 }
  0xa2   : > { %p2274_p4 = pnand %p2273_p12, %p2267_p9 }
  0xa4   : > { %2277 = shalt.err (!%p2274_p4)
}
  0xa5   : > { %1978 = dma.hbm_to_vmem [thread:$0]  (!%p2709_p6), %s3252_s11, 512, %s473_s23, [#allocation23], %s2571_s0, %s2571_s0, %s2572_s15  }
  0xa6   : > { %s3276_s2 = sld [smem:[#allocation38_spill]] }
  0xac   : > { %s2278_s22 = scalar_lea.hbm %s3276_s2, 16 }
  0xad   : > { %p2279_p13 = scmp.ne.s32.totalorder %s3276_s2, %s2278_s22  ;;  %p2285_p3 = scmp.lt.u32.totalorder %s2278_s22, %s3276_s2 }
  0xaf   : > { %p2281_p0 = pnand %p2279_p13, %p2723_p8 }
  0xb1   : > { %p2282_p1 = pneg %p2281_p0 }
  0xb3   : > { %p2287_p2 = pnand %p2285_p3, %p2282_p1 }
  0xb5   : > { %2290 = shalt.err (!%p2287_p2)
}
  0xb6   : > { %s2291_s24 = scalar_lea.vmem %s369_s29, 16  ;;  %s2298_s0 = scalar_lea.vmem %s369_s29, 32 }
  0xb7   : > { %p2292_p5 = scmp.ne.s32.totalorder %s369_s29, %s2291_s24  ;;  %p2299_p10 = scmp.lt.s32.totalorder %s369_s29, %s369_s29 }
  0xb8   : > { %p2300_p11 = scmp.lt.s32.totalorder %s2298_s0, %s2291_s24 }
  0xb9   : > { %p2294_p7 = pnand %p2292_p5, %p2723_p8 }
  0xba   : > { %p2301_p12 = por %p2300_p11, %p2299_p10 }
  0xbb   : > { %p2295_p9 = pneg %p2294_p7 }
  0xbd   : > { %p2302_p4 = pnand %p2301_p12, %p2295_p9 }
  0xbf   : > { %2305 = shalt.err (!%p2302_p4)
}
  0xc0   : > { %1951 = dma.hbm_to_vmem [thread:$0]  (!%p2709_p6), %s3276_s2, 16, %s369_s29, [#allocation8]  }
  0xc1   : > { %s2577_s19 = smov [#allocation12]   ;;  %s2578_s3 = smov [#allocation15]  }
  0xc2   : > { %s392_s13 = sshll.u32 %s2577_s19, 4  ;;  %s416_s14 = sshll.u32 %s2578_s3, 4  ;;  %s393_s13 = int_to_ptr.vmem [resolvable:$true] %s392_s13  ;;  %s417_s14 = int_to_ptr.vmem [resolvable:$true] %s416_s14 }
  0xc3   : > { %s2306_s30 = scalar_lea.hbm %s3245_s4, 16 }
  0xc4   : > { %p2307_p13 = scmp.ne.s32.totalorder %s3245_s4, %s2306_s30  ;;  %p2313_p3 = scmp.lt.u32.totalorder %s2306_s30, %s3245_s4 }
  0xc6   : > { %p2309_p0 = pnand %p2307_p13, %p2723_p8 }
  0xc8   : > { %p2310_p1 = pneg %p2309_p0 }
  0xca   : > { %p2315_p2 = pnand %p2313_p3, %p2310_p1 }
  0xcc   : > { %2318 = shalt.err (!%p2315_p2)
}
  0xcd   : > { %s2319_s29 = scalar_lea.vmem %s393_s13, 16  ;;  %s2326_s0 = scalar_lea.vmem %s393_s13, 32 }
  0xce   : > { %p2320_p5 = scmp.ne.s32.totalorder %s393_s13, %s2319_s29  ;;  %p2327_p10 = scmp.lt.s32.totalorder %s393_s13, %s393_s13 }
  0xcf   : > { %p2328_p11 = scmp.lt.s32.totalorder %s2326_s0, %s2319_s29 }
  0xd0   : > { %p2322_p7 = pnand %p2320_p5, %p2723_p8 }
  0xd1   : > { %p2329_p12 = por %p2328_p11, %p2327_p10 }
  0xd2   : > { %p2323_p9 = pneg %p2322_p7 }
  0xd4   : > { %p2330_p4 = pnand %p2329_p12, %p2323_p9 }
  0xd6   : > { %2333 = shalt.err (!%p2330_p4)
}
  0xd7   : > { %1957 = dma.hbm_to_vmem [thread:$0]  (!%p2709_p6), %s3245_s4, 16, %s393_s13, [#allocation11]  }
  0xd8   : > { %s2334_s21 = scalar_lea.hbm %s3247_s6, 16 }
  0xd9   : > { %p2335_p13 = scmp.ne.s32.totalorder %s3247_s6, %s2334_s21  ;;  %p2341_p3 = scmp.lt.u32.totalorder %s2334_s21, %s3247_s6 }
  0xdb   : > { %p2337_p0 = pnand %p2335_p13, %p2723_p8 }
  0xdd   : > { %p2338_p1 = pneg %p2337_p0 }
  0xdf   : > { %p2343_p2 = pnand %p2341_p3, %p2338_p1 }
  0xe1   : > { %2346 = shalt.err (!%p2343_p2)
}
  0xe2   : > { %s2347_s20 = scalar_lea.vmem %s417_s14, 16  ;;  %s2354_s13 = scalar_lea.vmem %s417_s14, 32 }
  0xe3   : > { %p2348_p5 = scmp.ne.s32.totalorder %s417_s14, %s2347_s20  ;;  %p2355_p10 = scmp.lt.s32.totalorder %s417_s14, %s417_s14 }
  0xe4   : > { %p2356_p11 = scmp.lt.s32.totalorder %s2354_s13, %s2347_s20 }
  0xe5   : > { %p2350_p7 = pnand %p2348_p5, %p2723_p8 }
  0xe6   : > { %p2357_p12 = por %p2356_p11, %p2355_p10 }
  0xe7   : > { %p2351_p9 = pneg %p2350_p7 }
  0xe9   : > { %p2358_p4 = pnand %p2357_p12, %p2351_p9 }
  0xeb   : > { %2361 = shalt.err (!%p2358_p4)
}
  0xec   : > { %1963 = dma.hbm_to_vmem [thread:$0]  (!%p2709_p6), %s3247_s6, 16, %s417_s14, [#allocation14]  }
  0xed   : > { %s2579_s0 = smov [#allocation18]   ;;  %s2580_s23 = smov [#allocation21]  }
  0xee   : > { %s438_s15 = sshll.u32 %s2579_s0, 4  ;;  %s462_s19 = sshll.u32 %s2580_s23, 4  ;;  %s439_s15 = int_to_ptr.vmem [resolvable:$true] %s438_s15  ;;  %s463_s19 = int_to_ptr.vmem [resolvable:$true] %s462_s19 }
  0xef   : > { %s2362_s22 = scalar_lea.hbm %s3249_s8, 16 }
  0xf0   : > { %p2363_p13 = scmp.ne.s32.totalorder %s3249_s8, %s2362_s22  ;;  %p2369_p3 = scmp.lt.u32.totalorder %s2362_s22, %s3249_s8 }
  0xf2   : > { %p2365_p0 = pnand %p2363_p13, %p2723_p8 }
  0xf4   : > { %p2366_p1 = pneg %p2365_p0 }
  0xf6   : > { %p2371_p2 = pnand %p2369_p3, %p2366_p1 }
  0xf8   : > { %2374 = shalt.err (!%p2371_p2)
}
  0xf9   : > { %s2375_s14 = scalar_lea.vmem %s439_s15, 16  ;;  %s2382_s13 = scalar_lea.vmem %s439_s15, 32 }
  0xfa   : > { %p2376_p5 = scmp.ne.s32.totalorder %s439_s15, %s2375_s14  ;;  %p2383_p10 = scmp.lt.s32.totalorder %s439_s15, %s439_s15 }
  0xfb   : > { %p2384_p11 = scmp.lt.s32.totalorder %s2382_s13, %s2375_s14 }
  0xfc   : > { %p2378_p7 = pnand %p2376_p5, %p2723_p8 }
  0xfd   : > { %p2385_p12 = por %p2384_p11, %p2383_p10 }
  0xfe   : > { %p2379_p9 = pneg %p2378_p7 }
 0x100   : > { %p2386_p4 = pnand %p2385_p12, %p2379_p9 }
 0x102   : > { %2389 = shalt.err (!%p2386_p4)
}
 0x103   : > { %1969 = dma.hbm_to_vmem [thread:$0]  (!%p2709_p6), %s3249_s8, 16, %s439_s15, [#allocation17]  }
 0x104   : > { %s2390_s3 = scalar_lea.hbm %s3251_s10, 16 }
 0x105   : > { %p2391_p13 = scmp.ne.s32.totalorder %s3251_s10, %s2390_s3  ;;  %p2397_p3 = scmp.lt.u32.totalorder %s2390_s3, %s3251_s10 }
 0x107   : > { %p2393_p0 = pnand %p2391_p13, %p2723_p8 }
 0x109   : > { %p2394_p1 = pneg %p2393_p0 }
 0x10b   : > { %p2399_p2 = pnand %p2397_p3, %p2394_p1 }
 0x10d   : > { %2402 = shalt.err (!%p2399_p2)
}
 0x10e   : > { %s2403_s1 = scalar_lea.vmem %s463_s19, 16  ;;  %s2410_s15 = scalar_lea.vmem %s463_s19, 32 }
 0x10f   : > { %p2404_p5 = scmp.ne.s32.totalorder %s463_s19, %s2403_s1  ;;  %p2411_p10 = scmp.lt.s32.totalorder %s463_s19, %s463_s19 }
 0x110   : > { %p2412_p11 = scmp.lt.s32.totalorder %s2410_s15, %s2403_s1 }
 0x111   : > { %p2406_p7 = pnand %p2404_p5, %p2723_p8 }
 0x112   : > { %p2413_p12 = por %p2412_p11, %p2411_p10 }
 0x113   : > { %p2407_p9 = pneg %p2406_p7 }
 0x115   : > { %p2414_p4 = pnand %p2413_p12, %p2407_p9 }
 0x117   : > { %2417 = shalt.err (!%p2414_p4)
}
 0x118   : > { %1975 = dma.hbm_to_vmem [thread:$0]  (!%p2709_p6), %s3251_s10, 16, %s463_s19, [#allocation20]  }
 0x119   : > { %s2581_s13 = smov [#allocation24]   ;;  %s2418_s23 = scalar_lea.hbm %s3253_s12, 16 }
 0x11a   : > { %s486_s24 = sshll.u32 %s2581_s13, 4  ;;  %p2419_p13 = scmp.ne.s32.totalorder %s3253_s12, %s2418_s23  ;;  %s487_s24 = int_to_ptr.vmem [resolvable:$true] %s486_s24 }
 0x11b   : > { %p2425_p3 = scmp.lt.u32.totalorder %s2418_s23, %s3253_s12 }
 0x11c   : > { %p2421_p0 = pnand %p2419_p13, %p2723_p8 }
 0x11e   : > { %p2422_p1 = pneg %p2421_p0 }
 0x120   : > { %p2427_p2 = pnand %p2425_p3, %p2422_p1 }
 0x122   : > { %2430 = shalt.err (!%p2427_p2)
}
 0x123   : > { %s2431_s19 = scalar_lea.vmem %s487_s24, 16  ;;  %s2438_s17 = scalar_lea.vmem %s487_s24, 32 }
 0x124   : > { %p2432_p5 = scmp.ne.s32.totalorder %s487_s24, %s2431_s19  ;;  %p2439_p10 = scmp.lt.s32.totalorder %s487_s24, %s487_s24 }
 0x125   : > { %p2440_p11 = scmp.lt.s32.totalorder %s2438_s17, %s2431_s19 }
 0x126   : > { %p2434_p7 = pnand %p2432_p5, %p2723_p8 }
 0x127   : > { %p2441_p12 = por %p2440_p11, %p2439_p10 }
 0x128   : > { %p2435_p9 = pneg %p2434_p7 }
 0x12a   : > { %p2442_p4 = pnand %p2441_p12, %p2435_p9 }
 0x12c   : > { %2445 = shalt.err (!%p2442_p4)
}
 0x12d   : > { %s3277_s16 = sld [smem:[#allocation34_spill]]  ;;  %s1705_s20 = sadd.s32 4294967294, %s2566_s28  }
 0x12e   : > { %1981 = dma.hbm_to_vmem [thread:$0]  (!%p2709_p6), %s3253_s12, 16, %s487_s24, [#allocation23]  }
 0x12f   : > { %s2967_s18 = sadd.s32 1, %s2566_s28   ;;  %s42_s13 = sadd.s32 1, %s2562_s27 }
 0x130   : > { %s39_s14 = ssub.s32 %s2566_s28, %s2967_s18  ;;  %p49_p13 = scmp.ne.s32.totalorder %s2562_s27, %s2558_s26 }
 0x131   : > { %p40_p8 = scmp.eq.s32.totalorder %s39_s14, 0  ;;  %p50_p0 = scmp.eq.s32.totalorder %s2566_s28, 0 }
 0x132   : > { %p55_p1 = scmp.ne.s32.totalorder %s2558_s26, %s2554_s25  ;;  %p337_p7 = scmp.eq.s32.totalorder %s1705_s20, 1 }
 0x133   : > { %s2978_s29 = scalar_select %p40_p8, %s2562_s27, %s42_s13  }
 0x134   : > { %p2980_p3 = por %p50_p0, %p49_p13  ;;  %p3279_p2 = scmp.eq.s32.totalorder %s3277_s16, 0 }
 0x135   : > { %p331_p5 = scmp.eq.s32.totalorder %s3277_s16, 1  ;;  %p2002_p9 = scmp.lt.s32.totalorder %s2566_s28, 2 }
 0x136   : > { %p2986_p6 = por %p3279_p2, %p55_p1  ;;  %s497_s23 = sand.u32 1, %s2562_s27  }
 0x137   : > { %p2993_p10 = por %p331_p5, %p49_p13  ;;  %p2997_p11 = por %p337_p7, %p55_p1 }
 0x138   : > { %s1720_s22 = sshll.u32 %s497_s23, 2  ;;  %s1721_s30 = sshll.u32 %s2566_s28, 6 }
 0x139   : > { %s3281_s3 = scalar_select %p2993_p10, 1, 0 }
 0x13a   : > { %s3282_s21 = scalar_select %p2997_p11, 1, 0 }
 0x13b   : > { %s3283_s1 = sld [smem:[#allocation36_spill]]  ;;  %s501_s16 = scalar_lea.vmem [#allocation4], %s1720_s22 }
 0x13c   : > { %s508_s20 = sshll.u32 %s501_s16, 4  ;;  %p3011_p12 = pnand %p2002_p9, %p2980_p3  ;;  %s3007_s20 = int_to_ptr.vmem [resolvable:$true] %s508_s20 }
 0x13d   : > { %s498_s13 = scalar_lea.sflag [#allocation5], %s497_s23 }
 0x13e   : > { %p2448_p8 = pneg %p3011_p12 }
 0x141   : > { %s3005_s15 = scalar_lea.hbm %s3283_s1, %s1721_s30  ;;  %s2451_s19 = scalar_lea.hbm %s3283_s1, 128 }
 0x142   : > { %s2446_s2 = scalar_lea.hbm %s3005_s15, 64  ;;  %p2452_p1 = scmp.lt.u32.totalorder %s3005_s15, %s3283_s1 }
 0x143   : > { %p2447_p4 = scmp.ne.s32.totalorder %s3005_s15, %s2446_s2  ;;  %p2453_p3 = scmp.lt.u32.totalorder %s2451_s19, %s2446_s2 }
 0x144   : > { %p2455_p5 = scmp.lt.u32.totalorder %s2446_s2, %s3005_s15 }
 0x145   : > { %p2449_p13 = pnand %p2448_p8, %p2447_p4  ;;  %p2454_p2 = por %p2453_p3, %p2452_p1 }
 0x147   : > { %p2450_p0 = pneg %p2449_p13  ;;  %p2456_p7 = por %p2455_p5, %p2454_p2 }
 0x149   : > { %p2457_p9 = pnand %p2456_p7, %p2450_p0 }
 0x14b   : > { %2460 = shalt.err (!%p2457_p9)
}
 0x14c   : > { %s2461_s23 = scalar_lea.vmem %s3007_s20, 64  ;;  %s2582_s16 = smov [#allocation4]  }
 0x14d   : > { %p2462_p4 = scmp.ne.s32.totalorder %s3007_s20, %s2461_s23  ;;  %s2466_s22 = sshll.u32 %s2582_s16, 4  ;;  %s2467_s22 = int_to_ptr.vmem [resolvable:$false] %s2466_s22 }
 0x14e   : > { %s2468_s30 = scalar_lea.vmem %s2467_s22, 128  ;;  %p2469_p10 = scmp.lt.s32.totalorder %s3007_s20, %s2467_s22 }
 0x14f   : > { %p2464_p13 = pnand %p2462_p4, %p2448_p8  ;;  %p2470_p1 = scmp.lt.s32.totalorder %s2468_s30, %s2461_s23 }
 0x151   : > { %p2465_p11 = pneg %p2464_p13  ;;  %p2471_p3 = por %p2470_p1, %p2469_p10 }
 0x153   : > { %p2472_p2 = pnand %p2471_p3, %p2465_p11 }
 0x155   : > { %2475 = shalt.err (!%p2472_p2)
}
 0x156   : > { %1985 = dma.hbm_to_vmem [thread:$0]  (!%p3011_p12), %s3005_s15, 64, %s3007_s20, %s498_s13  }
 0x157   : > { %s3285_s2 = sld [smem:[#allocation35_spill]] }
 0x15d   : > { %p3286_p0 = scmp.ne.s32.totalorder %s3285_s2, 0 }
 0x15e   : > { %s3043_s19 = sand.u32 (!%p3286_p0), 1, %s2558_s26  }
 0x15f   : > { %517 = sbr.rel (%p3286_p0) target bundleno = 2940 (0xb7c), region = 72  ;;  %s1723_s0 = sshll.u32 (!%p3286_p0), %s3043_s19, 2 }
 0x160   : > { %s520_s17 = scalar_lea.sflag (!%p3286_p0), [#allocation5], %s3043_s19  ;;  %s523_s23 = scalar_lea.vmem (!%p3286_p0), [#allocation4], %s1723_s0 }
 0x166   : > { %2521 = dma.done.wait (%p2986_p6), %s520_s17, 64  }
 0x167   : > { %2523 = vsyncadd (%p2986_p6), %s520_s17, 4294967232  ;;  %s3287_s15 = sld [smem:[#allocation34_spill]] }
 0x16d   : > { %p3288_p10 = scmp.eq.s32.totalorder %s3287_s15, 0 }
 0x16f   : > { %2525 = dma.done.wait (%p3288_p10), [#allocation8], 32   ;;  %p3289_p11 = pmov %p3288_p10 }
 0x170   : > { %p3290_p12 = pmov %p3288_p10 }
 0x171   : > { %2527 = vsyncadd (%p3289_p11), [#allocation8], 4294967264 }
 0x172   : > { %2529 = dma.done.wait (%p3290_p12), [#allocation11], 272   ;;  %p3291_p8 = pmov %p3288_p10 }
 0x174   : > { %2531 = vsyncadd (%p3291_p8), [#allocation11], 4294967024  ;;  %p3292_p5 = pmov %p3291_p8 }
 0x176   : > { %2533 = dma.done.wait (%p3292_p5), [#allocation14], 272   ;;  %p3293_p7 = pmov %p3292_p5 }
 0x177   : > { %p3294_p6 = pmov %p3292_p5 }
 0x178   : > { %2535 = vsyncadd (%p3293_p7), [#allocation14], 4294967024 }
 0x179   : > { %2537 = dma.done.wait (%p3294_p6), [#allocation17], 32   ;;  %p3295_p9 = pmov %p3292_p5 }
 0x17a   : > { %p3296_p4 = pmov %p3292_p5 }
 0x17b   : > { %2539 = vsyncadd (%p3295_p9), [#allocation17], 4294967264 }
 0x17c   : > { %2541 = dma.done.wait (%p3296_p4), [#allocation20], 272   ;;  %p3297_p13 = pmov %p3296_p4 }
 0x17d   : > { %p3298_p1 = pmov %p3296_p4 }
 0x17e   : > { %2543 = vsyncadd (%p3297_p13), [#allocation20], 4294967024 }
 0x17f   : > { %2545 = dma.done.wait (%p3298_p1), [#allocation23], 528   ;;  %p3299_p3 = pmov %p3298_p1 }
 0x180   : > { %vm619_vm0 = vcmask 261120   ;;  %v615_v0 = vld [vmem:[%s523_s23] sm:$0xf]  ;;  %v2078_v8 = vld [vmem:[#allocation10] sm:$0xff]   ;;  %v2583_v9 = vmov 0.0   ;;  %v2079_v10 = vld [vmem:[#allocation10 + $0x8] sm:$0xff]   ;;  %v973_v47 = vlaneseq }
 0x181   : > { %2547 = vsyncadd (%p3299_p3), [#allocation23], 4294966768  ;;  %v616_v1 = vunpack.c.l.bf16 %v615_v0  ;;  %1809 = vmatprep.subr.bf16.mxu0 %v2583_v9  ;;  %1817 = vmatprep.subr.bf16.mxu1 %v2583_v9  ;;  %vm2584_vm1 = vmmov 0   ;;  %v1737_v15 = vld [vmem:[#allocation7] ss:$0 sm:$0xff]  ;;  %vm716_vm2 = vcmask 60416  }
 0x182   : > { %1810 = vmatpush3.bf16.msra.mxu0 %v2078_v8  ;;  %1813 = vmatprep.mubr.msk.bf16.mxu0 %vm2584_vm1, %v2583_v9  ;;  %v1738_v17 = vld [vmem:[#allocation9] ss:$0 sm:$0xff]  ;;  %v1739_v21 = vld [vmem:[#allocation12] ss:$0 sm:$0xff]  ;;  %s2585_s24 = smov 80   ;;  %s2586_s20 = smov 96  }
 0x183   : > { %v620_v2 = vsel %vm619_vm0, %v616_v1, 0.0  ;;  %1811 = vmatprep.subr.bf16.mxu0 %v2583_v9  ;;  %1819 = vmatprep.mubr.msk.bf16.mxu1 %vm2584_vm1, %v2583_v9  ;;  %s2587_s14 = smov 88   ;;  %s2588_s13 = smov 120   ;;  %vm788_vm3 = vcmask 64512   ;;  %v974_v48 = vshrl.u32 %v973_v47, 7  ;;  %v976_v49 = vand.u32 127, %v973_v47 }
 0x184   : > { %621 = vadd.xlane.f32.xlu0 %v620_v2  ;;  %s2589_s16 = smov 72   ;;  %s2590_s22 = smov 112   ;;  %vm1035_vm5 = vcmask 1043456   ;;  %vm1226_vm6 = vcmask 126016   ;;  %vm1235_vm7 = vcmask 191616   ;;  %vm1244_vm8 = vcmask 257216  }
 0x185   : > { %s2591_s30 = smov 104   ;;  %vm977_vm4 = vcmp.le.s32.totalorder %v976_v49, %v974_v48  ;;  %s2592_s2 = smov 64   ;;  %vm1459_vm9 = vcmask 523264   ;;  %vm1505_vm10 = vcmask 257024  }
 0x186   : > { %1812 = vmatpush3.bf16.msra.mxu0 %v2079_v10  ;;  %s2593_s17 = smov 48   ;;  %s2594_s23 = smov 40  }
 0x187   : > { %1823 = vmatprep.subr.bf16.mxu0 %v2583_v9  ;;  %p3301_p0 = scmp.ne.s32.totalorder %s3281_s3, 0 }
 0x211   : > { %v622_v3 = vpop.xlane.xlu0 %621 }
 0x212   : > { %v624_v4 = vmul.f32 0.03125, %v622_v3 }
 0x214   : > { %v625_v5 = vsub.f32 %v616_v1, %v624_v4 }
 0x216   : > { %v626_v6 = vmul.f32 %v625_v5, %v625_v5 }
 0x218   : > { %v627_v7 = vsel %vm619_vm0, %v626_v6, 0.0 }
 0x219   : > { %628 = vadd.xlane.f32.xlu0 %v627_v7 }
 0x2a6   : > { %v629_v11 = vpop.xlane.xlu0 %628 }
 0x2a7   : > { %v630_v12 = vmul.f32 0.03125, %v629_v11 }
 0x2a9   : > { %v631_v13 = vadd.f32 1e-05, %v630_v12 }
 0x2ab   : > { %2088 = vrsqrt.f32 %v631_v13 }
 0x2b5   : > { %v2089_v14 = vpop.eup %2088 }
 0x2b6   : > { %v633_v16 = vmul.f32 %v2089_v14, %v625_v5 }
 0x2b8   : > { %v640_v18 = vmul.f32 %v1737_v15, %v633_v16 }
 0x2ba   : > { %v3087_v19 = vadd.f32 %v1738_v17, %v640_v18 }
 0x2bc   : > { %v648_v20 = vpack.c.bf16 %v3087_v19, %v3087_v19 }
 0x2be   : > { %1814 = vmatmul.mubr.msk.bf16.vlgmr.msra.gmra.mrb[0].mxu0 %vm619_vm0, %v648_v20 }
 0x2bf   : > { %1825 = vmatprep.mubr.msk.bf16.mxu0 %vm2584_vm1, %v2583_v9 }
 0x391   : > { %v709_v22 = vpop.f32.mrb[0].mxu0 }
 0x392   : > { %v710_v23 = vadd.f32 %v1739_v21, %v709_v22  ;;  %v1815_v24 = vpop.f32.mrb[1].mxu0 }
 0x393   : > { %v712_v25 = vpop.f32.mrb[2].mxu0 }
 0x394   : > { %v3094_v26 = vpack.c.bf16 %v710_v23, %v710_v23  ;;  %v1816_v27 = vpop.f32.mrb[3].mxu0 }
 0x396   : > { %746 = vrot.lane.b32.xlu0 %v3094_v26, %s2585_s24  ;;  %736 = vrot.lane.b32.xlu1 %v3094_v26, %s2586_s20  ;;  %717 = vst.msk [vmem:[#allocation2] sm:$0xf] %vm716_vm2, %v3094_v26  ;;  %s2595_s24 = smov 56   ;;  %s2596_s20 = smov 16  }
 0x39a   : > { %741 = vrot.lane.b32.xlu1 %v3094_v26, %s2587_s14  ;;  %s2597_s14 = smov 8  }
 0x39d   : > { %v776_v39 = vld [vmem:[#allocation2] sm:$0xf] }
 0x39e   : > { %721 = vrot.lane.b32.xlu1 %v3094_v26, %s2588_s13  ;;  %s2598_s13 = smov 24  }
 0x3a2   : > { %751 = vrot.lane.b32.xlu1 %v3094_v26, %s2589_s16  ;;  %s1772_s16 = sshll.u32 %s3287_s15, 6  ;;  %s1508_s15 = scalar_lea.sflag [#allocation6], %s3043_s19 }
 0x3a6   : > { %726 = vrot.lane.b32.xlu1 %v3094_v26, %s2590_s22  ;;  %s613_s22 = scalar_lea.vmem [#allocation25], %s1723_s0  ;;  %s2599_s0 = smov [#allocation25]  }
 0x3aa   : > { %731 = vrot.lane.b32.xlu1 %v3094_v26, %s2591_s30  ;;  %s1521_s30 = sshll.u32 %s613_s22, 4  ;;  %s3199_s30 = int_to_ptr.vmem [resolvable:$true] %s1521_s30 }
 0x408   : > { %v747_v28 = vpop.permute.xlu0 %746  ;;  %v737_v29 = vpop.permute.xlu1 %736 }
 0x409   : > { %750 = vst.msk [vmem:[#allocation2 + $0x18] sm:$0xf] %vm716_vm2, %v747_v28  ;;  %740 = vst.msk [vmem:[#allocation2 + $0x10] sm:$0xf] %vm716_vm2, %v737_v29 }
 0x40c   : > { %v742_v30 = vpop.permute.xlu1 %741 }
 0x40d   : > { %745 = vst.msk [vmem:[#allocation2 + $0x14] sm:$0xf] %vm716_vm2, %v742_v30 }
 0x410   : > { %v722_v31 = vpop.permute.xlu1 %721  ;;  %v780_v32 = vld [vmem:[#allocation2 + $0x10] sm:$0xf]  ;;  %v782_v37 = vld [vmem:[#allocation2 + $0x18] sm:$0xf] }
 0x411   : > { %725 = vst.msk [vmem:[#allocation2 + $0x4] sm:$0xf] %vm716_vm2, %v722_v31  ;;  %v793_v33 = vsel %vm788_vm3, %v780_v32, 0  ;;  %v885_v40 = vsel %vm788_vm3, %v782_v37, 0 }
 0x412   : > { %1818 = vmatpush3.bf16.xpose.msra.mxu1 %v793_v33 }
 0x413   : > { %1829 = vmatprep.subr.bf16.mxu1 %v2583_v9 }
 0x414   : > { %v752_v34 = vpop.permute.xlu1 %751  ;;  %v781_v35 = vld [vmem:[#allocation2 + $0x14] sm:$0xf] }
 0x415   : > { %755 = vst.msk [vmem:[#allocation2 + $0x1c] sm:$0xf] %vm716_vm2, %v752_v34  ;;  %v839_v36 = vsel %vm788_vm3, %v781_v35, 0 }
 0x416   : > { %1824 = vmatpush3.bf16.xpose.msra.mxu0 %v839_v36 }
 0x417   : > { %1835 = vmatprep.subr.bf16.mxu0 %v2583_v9 }
 0x418   : > { %v727_v38 = vpop.permute.xlu1 %726  ;;  %v777_v42 = vld [vmem:[#allocation2 + $0x4] sm:$0xf] }
 0x419   : > { %730 = vst.msk [vmem:[#allocation2 + $0x8] sm:$0xf] %vm716_vm2, %v727_v38  ;;  %1820 = vmatmul.mubr.msk.bf16.vlgmr.msra.gmra.mrb[0].mxu1 %vm788_vm3, %v776_v39 }
 0x41a   : > { %1830 = vmatpush3.bf16.xpose.msra.mxu1 %v885_v40  ;;  %1831 = vmatprep.mubr.msk.bf16.mxu1 %vm2584_vm1, %v2583_v9 }
 0x41b   : > { %1841 = vmatprep.subr.bf16.mxu1 %v2583_v9 }
 0x41c   : > { %v732_v41 = vpop.permute.xlu1 %731  ;;  %v783_v43 = vld [vmem:[#allocation2 + $0x1c] sm:$0xf] }
 0x41d   : > { %735 = vst.msk [vmem:[#allocation2 + $0xc] sm:$0xf] %vm716_vm2, %v732_v41  ;;  %1826 = vmatmul.mubr.msk.bf16.vlgmr.msra.gmra.mrb[4].mxu0 %vm788_vm3, %v777_v42  ;;  %v931_v44 = vsel %vm788_vm3, %v783_v43, 0 }
 0x41e   : > { %1836 = vmatpush3.bf16.xpose.msra.mxu0 %v931_v44  ;;  %1837 = vmatprep.mubr.msk.bf16.mxu0 %vm2584_vm1, %v2583_v9 }
 0x41f   : > { %1847 = vmatprep.subr.bf16.mxu0 %v2583_v9 }
 0x420   : > { %v778_v45 = vld [vmem:[#allocation2 + $0x8] sm:$0xf] }
 0x421   : > { %1832 = vmatmul.mubr.msk.bf16.vlgmr.msra.gmra.mrb[4].mxu1 %vm788_vm3, %v778_v45 }
 0x422   : > { %1843 = vmatprep.mubr.msk.bf16.mxu1 %vm2584_vm1, %v2583_v9 }
 0x424   : > { %v779_v46 = vld [vmem:[#allocation2 + $0xc] sm:$0xf] }
 0x425   : > { %1838 = vmatmul.mubr.msk.bf16.vlgmr.msra.gmra.mrb[8].mxu0 %vm788_vm3, %v779_v46 }
 0x426   : > { %1849 = vmatprep.mubr.msk.bf16.mxu0 %vm2584_vm1, %v2583_v9 }
 0x4ec   : > { %v829_v50 = vpop.f32.mrb[0].mxu1 }
 0x4ed   : > { %v980_v51 = vsel %vm977_vm4, %v829_v50, -1e+30  ;;  %v1821_v52 = vpop.f32.mrb[1].mxu1 }
 0x4ee   : > { %v832_v53 = vpop.f32.mrb[2].mxu1  ;;  %v984_v54 = vsel %vm788_vm3, %v980_v51, -inf }
 0x4ef   : > { %985 = vmax.xlane.f32.xlu1 %v984_v54  ;;  %v1822_v55 = vpop.f32.mrb[3].mxu1 }
 0x4f0   : > { %v875_v56 = vpop.f32.mrb[4].mxu0 }
 0x4f1   : > { %v981_v57 = vsel %vm977_vm4, %v875_v56, -1e+30  ;;  %v1827_v58 = vpop.f32.mrb[5].mxu0 }
 0x4f2   : > { %v878_v59 = vpop.f32.mrb[6].mxu0  ;;  %v987_v60 = vsel %vm788_vm3, %v981_v57, -inf }
 0x4f3   : > { %988 = vmax.xlane.f32.xlu0 %v987_v60  ;;  %v1828_v61 = vpop.f32.mrb[7].mxu0 }
 0x4f4   : > { %v921_v62 = vpop.f32.mrb[4].mxu1 }
 0x4f5   : > { %v982_v63 = vsel %vm977_vm4, %v921_v62, -1e+30  ;;  %v1833_v0 = vpop.f32.mrb[5].mxu1 }
 0x4f6   : > { %v924_v1 = vpop.f32.mrb[6].mxu1  ;;  %v990_v2 = vsel %vm788_vm3, %v982_v63, -inf }
 0x4f7   : > { %991 = vmax.xlane.f32.xlu1 %v990_v2  ;;  %v1834_v3 = vpop.f32.mrb[7].mxu1 }
 0x4f8   : > { %v967_v4 = vpop.f32.mrb[8].mxu0 }
 0x4f9   : > { %v983_v5 = vsel %vm977_vm4, %v967_v4, -1e+30  ;;  %v1839_v6 = vpop.f32.mrb[9].mxu0  ;;  %v2080_v4 = vld [vmem:[#allocation13] sm:$0xff]  }
 0x4fa   : > { %v970_v7 = vpop.f32.mrb[10].mxu0  ;;  %v993_v8 = vsel %vm788_vm3, %v983_v5, -inf }
 0x4fb   : > { %994 = vmax.xlane.f32.xlu0 %v993_v8  ;;  %v1840_v10 = vpop.f32.mrb[11].mxu0  ;;  %v2081_v7 = vld [vmem:[#allocation13 + $0x8] sm:$0xff]  }
 0x508   : > { %756 = vrot.lane.b32.xlu1 %v3094_v26, %s2592_s2 }
 0x57c   : > { %v986_v11 = vpop.xlane.xlu1 %985 }
 0x57d   : > { %v996_v12 = vsub.f32 %v980_v51, %v986_v11 }
 0x57f   : > { %v1000_v13 = vmul.f32 1.442695, %v996_v12 }
 0x580   : > { %v989_v14 = vpop.xlane.xlu0 %988 }
 0x581   : > { %2090 = vpow2.f32 %v1000_v13  ;;  %v997_v15 = vsub.f32 %v981_v57, %v989_v14 }
 0x583   : > { %v1002_v16 = vmul.f32 1.442695, %v997_v15 }
 0x584   : > { %v992_v17 = vpop.xlane.xlu1 %991 }
 0x585   : > { %2092 = vpow2.f32 %v1002_v16  ;;  %v998_v18 = vsub.f32 %v982_v63, %v992_v17 }
 0x587   : > { %v1004_v20 = vmul.f32 1.442695, %v998_v18 }
 0x588   : > { %v757_v21 = vpop.permute.xlu1 %756  ;;  %v995_v22 = vpop.xlane.xlu0 %994 }
 0x589   : > { %2094 = vpow2.f32 %v1004_v20  ;;  %760 = vst.msk [vmem:[#allocation2 + $0x20] sm:$0xf] %vm716_vm2, %v757_v21  ;;  %v999_v23 = vsub.f32 %v983_v5, %v995_v22 }
 0x58b   : > { %v2091_v24 = vpop.eup %2090  ;;  %v1006_v25 = vmul.f32 1.442695, %v999_v23 }
 0x58c   : > { %v1008_v27 = vsel %vm788_vm3, %v2091_v24, 0.0 }
 0x58d   : > { %2096 = vpow2.f32 %v1006_v25  ;;  %1009 = vadd.xlane.f32.xlu1 %v1008_v27 }
 0x58f   : > { %v2093_v28 = vpop.eup %2092 }
 0x590   : > { %v1011_v29 = vsel %vm788_vm3, %v2093_v28, 0.0  ;;  %v784_v30 = vld [vmem:[#allocation2 + $0x20] sm:$0xf] }
 0x591   : > { %1012 = vadd.xlane.f32.xlu0 %v1011_v29  ;;  %v1037_v31 = vsel %vm1035_vm5, %v784_v30, 0 }
 0x592   : > { %1842 = vmatpush3.bf16.msra.mxu1 %v1037_v31 }
 0x593   : > { %v2095_v32 = vpop.eup %2094  ;;  %1853 = vmatprep.subr.bf16.mxu1 %v2583_v9 }
 0x594   : > { %v1014_v33 = vsel %vm788_vm3, %v2095_v32, 0.0 }
 0x595   : > { %1015 = vadd.xlane.f32.xlu1 %v1014_v33 }
 0x597   : > { %v2097_v34 = vpop.eup %2096 }
 0x598   : > { %v1017_v35 = vsel %vm788_vm3, %v2097_v34, 0.0 }
 0x599   : > { %1018 = vadd.xlane.f32.xlu0 %v1017_v35 }
 0x5a6   : > { %766 = vrot.lane.b32.xlu1 %v3094_v26, %s2593_s17 }
 0x5aa   : > { %771 = vrot.lane.b32.xlu1 %v3094_v26, %s2594_s23  ;;  %s3300_s23 = sld [smem:[#allocation40_spill]] }
 0x5af   : > { %761 = vrot.lane.b32.xlu0 %v3094_v26, %s2595_s24 }
 0x5b0   : > { %s3197_s24 = scalar_lea.hbm %s3300_s23, %s1772_s16 }
 0x61a   : > { %v1010_v36 = vpop.xlane.xlu1 %1009 }
 0x61b   : > { %2098 = vrcp.f32 %v1010_v36 }
 0x61e   : > { %v1013_v37 = vpop.xlane.xlu0 %1012 }
 0x622   : > { %v1016_v38 = vpop.xlane.xlu1 %1015 }
 0x623   : > { %2100 = vrcp.f32 %v1016_v38  ;;  %v2082_v38 = vld [vmem:[#allocation19] sm:$0xff]  }
 0x624   : > { %2102 = vrcp.f32 %v1013_v37 }
 0x625   : > { %v2099_v39 = vpop.eup %2098 }
 0x626   : > { %v1024_v40 = vmul.f32 %v2099_v39, %v2091_v24  ;;  %v767_v41 = vpop.permute.xlu1 %766  ;;  %v1019_v42 = vpop.xlane.xlu0 %1018  ;;  %v1755_v24 = vld [vmem:[#allocation15] ss:$0 sm:$0xff]  ;;  %v2083_v39 = vld [vmem:[#allocation19 + $0x8] sm:$0xff]  }
 0x627   : > { %770 = vst.msk [vmem:[#allocation2 + $0x28] sm:$0xf] %vm716_vm2, %v767_v41  ;;  %2104 = vrcp.f32 %v1019_v42 }
 0x628   : > { %v1028_v43 = vpack.c.bf16 %v1024_v40, %v1024_v40 }
 0x62a   : > { %1844 = vmatmul.mubr.msk.bf16.vlgmr.msra.gmra.mrb[8].mxu1 %vm788_vm3, %v1028_v43  ;;  %v772_v44 = vpop.permute.xlu1 %771  ;;  %v762_v45 = vpop.permute.xlu0 %761  ;;  %v1759_v43 = vld [vmem:[#allocation16] ss:$0 sm:$0xff] }
 0x62b   : > { %775 = vst.msk [vmem:[#allocation2 + $0x2c] sm:$0xf] %vm716_vm2, %v772_v44  ;;  %765 = vst.msk [vmem:[#allocation2 + $0x24] sm:$0xf] %vm716_vm2, %v762_v45  ;;  %1855 = vmatprep.mubr.msk.bf16.mxu1 %vm2584_vm1, %v2583_v9  ;;  %v1760_v45 = vld [vmem:[#allocation18] ss:$0 sm:$0xff] }
 0x62d   : > { %v2101_v26 = vpop.eup %2100 }
 0x62e   : > { %v2103_v46 = vpop.eup %2102  ;;  %v1026_v47 = vmul.f32 %v2101_v26, %v2095_v32  ;;  %v786_v48 = vld [vmem:[#allocation2 + $0x28] sm:$0xf] }
 0x62f   : > { %v1129_v49 = vsel %vm1035_vm5, %v786_v48, 0  ;;  %v1025_v51 = vmul.f32 %v2103_v46, %v2093_v28  ;;  %v2084_v48 = vld [vmem:[#allocation22] sm:$0xff]  }
 0x630   : > { %1854 = vmatpush3.bf16.msra.mxu1 %v1129_v49  ;;  %v1030_v50 = vpack.c.bf16 %v1026_v47, %v1026_v47  ;;  %v2085_v49 = vld [vmem:[#allocation22 + $0x8] sm:$0xff]  }
 0x631   : > { %1865 = vmatprep.subr.bf16.mxu1 %v2583_v9  ;;  %v1029_v55 = vpack.c.bf16 %v1025_v51, %v1025_v51  ;;  %v2105_v56 = vpop.eup %2104  ;;  %v2087_v51 = vld [vmem:[#allocation22 + $0x18] sm:$0xff]  }
 0x632   : > { %v785_v52 = vld [vmem:[#allocation2 + $0x24] sm:$0xf]  ;;  %v787_v54 = vld [vmem:[#allocation2 + $0x2c] sm:$0xf]  ;;  %v1027_v58 = vmul.f32 %v2105_v56, %v2097_v34 }
 0x633   : > { %1856 = vmatmul.mubr.msk.bf16.vlgmr.msra.gmra.mrb[12].mxu1 %vm788_vm3, %v1030_v50  ;;  %v1083_v53 = vsel %vm1035_vm5, %v785_v52, 0  ;;  %v1175_v57 = vsel %vm1035_vm5, %v787_v54, 0  ;;  %v2086_v50 = vld [vmem:[#allocation22 + $0x10] sm:$0xff]   ;;  %v1761_v52 = vld [vmem:[#allocation21] ss:$0 sm:$0xff] }
 0x634   : > { %1848 = vmatpush3.bf16.msra.mxu0 %v1083_v53  ;;  %1869 = vmatprep.mubr.msk.bf16.mxu1 %vm2584_vm1, %v2583_v9  ;;  %v1031_v59 = vpack.c.bf16 %v1027_v58, %v1027_v58 }
 0x635   : > { %1859 = vmatprep.subr.bf16.mxu0 %v2583_v9  ;;  %1866 = vmatpush3.bf16.msra.mxu1 %v2080_v4 }
 0x636   : > { %1867 = vmatprep.subr.bf16.mxu1 %v2583_v9 }
 0x637   : > { %1850 = vmatmul.mubr.msk.bf16.vlgmr.msra.gmra.mrb[12].mxu0 %vm788_vm3, %v1029_v55 }
 0x638   : > { %1860 = vmatpush3.bf16.msra.mxu0 %v1175_v57  ;;  %1861 = vmatprep.mubr.msk.bf16.mxu0 %vm2584_vm1, %v2583_v9 }
 0x639   : > { %1873 = vmatprep.subr.bf16.mxu0 %v2583_v9  ;;  %1868 = vmatpush3.bf16.msra.mxu1 %v2081_v7 }
 0x63a   : > { %1881 = vmatprep.subr.bf16.mxu1 %v2583_v9 }
 0x63f   : > { %1862 = vmatmul.mubr.msk.bf16.vlgmr.msra.gmra.mrb[16].mxu0 %vm788_vm3, %v1031_v59 }
 0x640   : > { %1877 = vmatprep.mubr.msk.bf16.mxu0 %vm2584_vm1, %v2583_v9  ;;  %1874 = vmatpush3.bf16.msra.mxu0 %v2082_v38 }
 0x641   : > { %1875 = vmatprep.subr.bf16.mxu0 %v2583_v9 }
 0x644   : > { %1876 = vmatpush3.bf16.msra.mxu0 %v2083_v39 }
 0x6fd   : > { %v1073_v60 = vpop.f32.mrb[8].mxu1 }
 0x6fe   : > { %v1217_v61 = vpack.c.bf16 %v1073_v60, %v1073_v60  ;;  %v1845_v62 = vpop.f32.mrb[9].mxu1 }
 0x6ff   : > { %v1076_v63 = vpop.f32.mrb[10].mxu1 }
 0x700   : > { %1218 = vst.msk [vmem:[#allocation3] sm:$0xf] %vm716_vm2, %v1217_v61  ;;  %v1846_v0 = vpop.f32.mrb[11].mxu1 }
 0x706   : > { %v1165_v1 = vpop.f32.mrb[12].mxu1 }
 0x707   : > { %v1777_v2 = vpack.c.bf16 %v1165_v1, %v1165_v1  ;;  %v1857_v3 = vpop.f32.mrb[13].mxu1 }
 0x708   : > { %v1168_v5 = vpop.f32.mrb[14].mxu1  ;;  %v1765_v3 = vld [vmem:[#allocation24] ss:$0 sm:$0xff] }
 0x709   : > { %1232 = vrot.lane.b32.xlu1 %v1777_v2, %s2596_s20  ;;  %v1858_v6 = vpop.f32.mrb[15].mxu1  ;;  %s2476_s20 = scalar_lea.vmem %s3199_s30, 64 }
 0x70a   : > { %v1119_v8 = vpop.f32.mrb[12].mxu0  ;;  %p2477_p2 = scmp.ne.s32.totalorder %s3199_s30, %s2476_s20 }
 0x70b   : > { %v1776_v10 = vpack.c.bf16 %v1119_v8, %v1119_v8  ;;  %v1851_v11 = vpop.f32.mrb[13].mxu0 }
 0x70c   : > { %v1122_v12 = vpop.f32.mrb[14].mxu0  ;;  %p2478_p10 = pnand %p2477_p2, %p3301_p0 }
 0x70d   : > { %1223 = vrot.lane.b32.xlu0 %v1776_v10, %s2597_s14  ;;  %v1852_v13 = vpop.f32.mrb[15].mxu0  ;;  %s2480_s14 = sshll.u32 %s2599_s0, 4  ;;  %s2481_s14 = int_to_ptr.vmem [resolvable:$false] %s2480_s14 }
 0x70e   : > { %p2479_p11 = pneg %p2478_p10  ;;  %p2483_p12 = scmp.lt.s32.totalorder %s3199_s30, %s2481_s14 }
 0x712   : > { %v1211_v14 = vpop.f32.mrb[16].mxu0 }
 0x713   : > { %v1778_v15 = vpack.c.bf16 %v1211_v14, %v1211_v14  ;;  %v1863_v16 = vpop.f32.mrb[17].mxu0 }
 0x714   : > { %v1214_v17 = vpop.f32.mrb[18].mxu0 }
 0x715   : > { %1241 = vrot.lane.b32.xlu0 %v1778_v15, %s2598_s13  ;;  %v1864_v18 = vpop.f32.mrb[19].mxu0  ;;  %s2482_s13 = scalar_lea.vmem %s2481_s14, 128 }
 0x716   : > { %p2484_p8 = scmp.lt.s32.totalorder %s2482_s13, %s2476_s20 }
 0x718   : > { %p2485_p5 = por %p2484_p8, %p2483_p12 }
 0x71a   : > { %p2486_p7 = pnand %p2485_p5, %p2479_p11 }
 0x77b   : > { %v1233_v21 = vpop.permute.xlu1 %1232 }
 0x77f   : > { %v1224_v20 = vpop.permute.xlu0 %1223 }
 0x780   : > { %1227 = vst.msk [vmem:[#allocation3] sm:$0xf] %vm1226_vm6, %v1224_v20 }
 0x781   : > { %1236 = vst.msk [vmem:[#allocation3] sm:$0xf] %vm1235_vm7, %v1233_v21 }
 0x787   : > { %v1242_v22 = vpop.permute.xlu0 %1241 }
 0x788   : > { %1245 = vst.msk [vmem:[#allocation3] sm:$0xf] %vm1244_vm8, %v1242_v22 }
 0x78f   : > { %v1246_v23 = vld [vmem:[#allocation3] sm:$0xf] }
 0x790   : > { %1870 = vmatmul.mubr.msk.bf16.vlgmr.msra.gmra.mrb[16].mxu1 %vm619_vm0, %v1246_v23 }
 0x791   : > { %1889 = vmatprep.mubr.msk.bf16.mxu1 %vm2584_vm1, %v2583_v9  ;;  %1882 = vmatpush3.bf16.msra.mxu1 %v2084_v48 }
 0x792   : > { %1883 = vmatprep.subr.bf16.mxu1 %v2583_v9 }
 0x795   : > { %1884 = vmatpush3.bf16.msra.mxu1 %v2085_v49 }
 0x796   : > { %1885 = vmatprep.subr.bf16.mxu1 %v2583_v9 }
 0x799   : > { %1886 = vmatpush3.bf16.msra.mxu1 %v2086_v50 }
 0x79a   : > { %1887 = vmatprep.subr.bf16.mxu1 %v2583_v9 }
 0x79d   : > { %1888 = vmatpush3.bf16.msra.mxu1 %v2087_v51 }
 0x863   : > { %v1307_v25 = vpop.f32.mrb[16].mxu1 }
 0x864   : > { %v1308_v27 = vadd.f32 %v1755_v24, %v1307_v25  ;;  %v1871_v28 = vpop.f32.mrb[17].mxu1 }
 0x865   : > { %v1310_v29 = vpop.f32.mrb[18].mxu1 }
 0x866   : > { %v3179_v30 = vadd.f32 %v1308_v27, %v3087_v19  ;;  %v1872_v31 = vpop.f32.mrb[19].mxu1 }
 0x868   : > { %v1316_v32 = vsel %vm619_vm0, %v3179_v30, 0.0 }
 0x869   : > { %1317 = vadd.xlane.f32.xlu1 %v1316_v32 }
 0x8f6   : > { %v1318_v33 = vpop.xlane.xlu1 %1317 }
 0x8f7   : > { %v1319_v34 = vmul.f32 0.03125, %v1318_v33 }
 0x8f9   : > { %v1320_v35 = vsub.f32 %v3179_v30, %v1319_v34 }
 0x8fb   : > { %v1321_v36 = vmul.f32 %v1320_v35, %v1320_v35 }
 0x8fd   : > { %v1322_v37 = vsel %vm619_vm0, %v1321_v36, 0.0 }
 0x8fe   : > { %1323 = vadd.xlane.f32.xlu0 %v1322_v37 }
 0x98b   : > { %v1324_v19 = vpop.xlane.xlu0 %1323 }
 0x98c   : > { %v1325_v40 = vmul.f32 0.03125, %v1324_v19 }
 0x98e   : > { %v1326_v41 = vadd.f32 1e-05, %v1325_v40 }
 0x990   : > { %2106 = vrsqrt.f32 %v1326_v41 }
 0x99a   : > { %v2107_v42 = vpop.eup %2106 }
 0x99b   : > { %v1328_v44 = vmul.f32 %v2107_v42, %v1320_v35 }
 0x99d   : > { %v1335_v26 = vmul.f32 %v1759_v43, %v1328_v44 }
 0x99f   : > { %v1342_v46 = vadd.f32 %v1760_v45, %v1335_v26 }
 0x9a1   : > { %v1343_v47 = vpack.c.bf16 %v1342_v46, %v1342_v46 }
 0x9a3   : > { %1878 = vmatmul.mubr.msk.bf16.vlgmr.msra.gmra.mrb[20].mxu0 %vm619_vm0, %v1343_v47 }
 0xa76   : > { %v1404_v53 = vpop.f32.mrb[20].mxu0 }
 0xa77   : > { %v1405_v54 = vadd.f32 %v1761_v52, %v1404_v53  ;;  %v1879_v55 = vpop.f32.mrb[21].mxu0 }
 0xa78   : > { %v1407_v56 = vpop.f32.mrb[22].mxu0 }
 0xa79   : > { %v1411_v57 = vmul.f32 0.044715, %v1405_v54  ;;  %v1880_v58 = vpop.f32.mrb[23].mxu0  ;;  %v1410_v0 = vmul.f32 0.5, %v1405_v54 }
 0xa7b   : > { %v1412_v59 = vmul.f32 %v1411_v57, %v1405_v54 }
 0xa7d   : > { %v1413_v60 = vmul.f32 %v1412_v59, %v1405_v54 }
 0xa7f   : > { %v1414_v61 = vadd.f32 %v1413_v60, %v1405_v54 }
 0xa81   : > { %v1415_v62 = vmul.f32 0.7978846, %v1414_v61 }
 0xa83   : > { %2108 = vtanh.f32 %v1415_v62 }
 0xa8d   : > { %v2109_v63 = vpop.eup %2108 }
 0xa8e   : > { %v1417_v1 = vadd.f32 1.0, %v2109_v63 }
 0xa90   : > { %v1418_v2 = vmul.f32 %v1417_v1, %v1410_v0 }
 0xa92   : > { %v1419_v9 = vpack.c.bf16 %v1418_v2, %v1418_v2 }
 0xa94   : > { %1890 = vmatmul.mubr.msk.bf16.vlgmr.msra.gmra.mrb[20].mxu1 %vm1459_vm9, %v1419_v9 }
 0xb67   : > { %v1497_v4 = vpop.f32.mrb[20].mxu1 }
 0xb68   : > { %v1498_v5 = vadd.f32 %v1765_v3, %v1497_v4  ;;  %v1891_v6 = vpop.f32.mrb[21].mxu1 }
 0xb69   : > { %v1500_v7 = vpop.f32.mrb[22].mxu1 }
 0xb6a   : > { %v1503_v8 = vadd.f32 %v1498_v5, %v3179_v30  ;;  %v1892_v10 = vpop.f32.mrb[23].mxu1 }
 0xb6c   : > { %v1504_v11 = vpack.c.bf16 %v1503_v8, %v1503_v8 }
 0xb6e   : > { %1506 = vst.msk [vmem:[%s613_s22] sm:$0xf] %vm1505_vm10, %v1504_v11 }
 0xb6f   : > { %2489 = shalt.err (!%p2486_p7)
}
 0xb70   : > { %s2490_s19 = scalar_lea.hbm %s3197_s24, 64  ;;  %s2494_s2 = scalar_lea.hbm %s3300_s23, 128 }
 0xb71   : > { %p2491_p6 = scmp.ne.s32.totalorder %s3197_s24, %s2490_s19  ;;  %p2495_p13 = scmp.lt.u32.totalorder %s3197_s24, %s3300_s23 }
 0xb72   : > { %p2496_p1 = scmp.lt.u32.totalorder %s2494_s2, %s2490_s19  ;;  %p2498_p2 = scmp.lt.u32.totalorder %s2490_s19, %s3197_s24 }
 0xb73   : > { %p2492_p9 = pnand %p2491_p6, %p3301_p0 }
 0xb74   : > { %p2497_p3 = por %p2496_p1, %p2495_p13 }
 0xb75   : > { %p2493_p4 = pneg %p2492_p9 }
 0xb76   : > { %p2499_p10 = por %p2498_p2, %p2497_p3 }
 0xb78   : > { %p2500_p11 = pnand %p2499_p10, %p2493_p4 }
 0xb7a   : > { %2503 = shalt.err (!%p2500_p11)
}
 0xb7b   : > { %1943 = dma.vmem_to_hbm [thread:$0]  (%p3301_p0), %s3199_s30, 64, %s3197_s24, %s1508_s15  }
 0xb7c PF: > { %s1533_s20 = sand.u32 1, %s2554_s25   ;;  %p3302_p12 = scmp.ne.s32.totalorder %s3282_s21, 0 }
 0xb7d   : > { %p3303_p8 = scmp.ge.s32.totalorder %s2566_s28, 2  ;;  %s1534_s14 = scalar_lea.sflag [#allocation6], %s1533_s20 }
 0xb7f   : > { %p1987_p5 = pnand %p3303_p8, %p3302_p12 }
 0xb81   : > { %2549 = dma.done.wait (!%p1987_p5), %s1534_s14, 64  }
 0xb82   : > { %2551 = vsyncadd (!%p1987_p5), %s1534_s14, 4294967232  ;;  %p32_p7 = scmp.ge.s32.totalorder %s2967_s18, 4   ;;  %s3304_s25 = smov %s2558_s26 }
 0xb83   : > { %s3305_s26 = smov %s2562_s27  ;;  %s3306_s27 = smov %s2978_s29 }
 0xb84   : > { %s3307_s28 = smov %s2967_s18  ;;  %34 = sbr.rel (!%p32_p7) target bundleno = 17 (0x11), region = 176 }
 0xb8b   :  { %1539 = vsyncpa [#allocation5], 1 }
 0xb8c   :  { %1541 = vsyncpa [#allocation5 + $0x1], 1 }
 0xb8d   :  { %1542 = vsyncpa [#allocation8], 1 }
 0xb8e   :  { %1543 = vsyncpa [#allocation11], 1 }
 0xb8f   :  { %1544 = vsyncpa [#allocation14], 1 }
 0xb90   :  { %1545 = vsyncpa [#allocation17], 1 }
 0xb91   :  { %1546 = vsyncpa [#allocation20], 1 }
 0xb92   :  { %1547 = vsyncpa [#allocation23], 1 }
 0xb93   :  { %1548 = vsyncpa [#allocation6], 1 }
 0xb94   :  { %1550 = vsyncpa [#allocation6 + $0x1], 1 }

</bundles_post_ra>
